<compile_context>
chip_gen: v7x
topology: tpu7x:2x2x1
jax: 0.10.0
libtpu: 0.0.40
codegen_flags: <defaults>
</compile_context>

<pallas_src>
import jax
import jax.numpy as jnp
import numpy as np
from jax.experimental import pallas as pl
from jax.experimental.pallas import tpu as pltpu

BN_EPS = 1e-5        # PyTorch BatchNorm1d default eps
BN_MOMENTUM = 0.1    # PyTorch BatchNorm1d default momentum

# Packed 1-D parameter row indices (rows of the (5, D) per-layer array).
_ROW_BIAS, _ROW_GAMMA, _ROW_BETA, _ROW_RMEAN, _ROW_RVAR = 0, 1, 2, 3, 4


# ----------------------------------------------------------------------------
# Kernels
# ----------------------------------------------------------------------------
def _head_train_kernel(
    x_ref,                 # (B, Cin)  f32  (cast to bf16 in-kernel)
    w1_ref, p1_ref,        # (Cin, H) bf16, (5, H) f32 packed [b, g, beta, rmean, rvar]
    w2_ref, p2_ref,        # (H, C)  bf16, (5, C) f32 packed
    feat_ref, id_ref,      # outputs: (B, H) f32, (B, C) f32
    stats1_ref, stats2_ref # outputs: (2, H) f32, (2, C) f32 = updated running [mean; var]
):
    """forward(x, train=True): feature = bn1(fc1(x)); identity = bn2(fc2(feature)).

    BatchNorm1d training mode -> batch statistics (biased var for normalization),
    matching PyTorch; momentum-updated running stats (unbiased var) emitted directly.
    """
    B = x_ref.shape[0]
    unbias = B / max(B - 1, 1)
    one_m = 1.0 - BN_MOMENTUM

    x = x_ref[...].astype(jnp.bfloat16)

    # ---- fc1 (MXU, bf16 in / f32 accumulate) + bias -------------------------
    h1 = jnp.dot(x, w1_ref[...], preferred_element_type=jnp.float32) + p1_ref[0:1, :]
    # ---- bn1 with batch statistics (reduction over batch / sublane axis) ----
    m1 = jnp.mean(h1, axis=0, keepdims=True)
    c1 = h1 - m1
    v1 = jnp.mean(c1 * c1, axis=0, keepdims=True)
    s1 = p1_ref[1:2, :] * jax.lax.rsqrt(v1 + BN_EPS)           # (1, H) row, rsqrt on EUP
    feat = c1 * s1 + p1_ref[2:3, :]
    feat_ref[...] = feat
    # fused running-stat momentum update (PyTorch stores unbiased batch var)
    stats1_ref[...] = jnp.concatenate(
        [one_m * p1_ref[3:4, :] + BN_MOMENTUM * m1,
         one_m * p1_ref[4:5, :] + BN_MOMENTUM * (v1 * unbias)], axis=0)

    # ---- fc2 (MXU) + bias ----------------------------------------------------
    h2 = (jnp.dot(feat.astype(jnp.bfloat16), w2_ref[...],
                  preferred_element_type=jnp.float32) + p2_ref[0:1, :])
    # ---- bn2 with batch statistics ------------------------------------------
    m2 = jnp.mean(h2, axis=0, keepdims=True)
    c2 = h2 - m2
    v2 = jnp.mean(c2 * c2, axis=0, keepdims=True)
    s2 = p2_ref[1:2, :] * jax.lax.rsqrt(v2 + BN_EPS)
    id_ref[...] = c2 * s2 + p2_ref[2:3, :]
    stats2_ref[...] = jnp.concatenate(
        [one_m * p2_ref[3:4, :] + BN_MOMENTUM * m2,
         one_m * p2_ref[4:5, :] + BN_MOMENTUM * (v2 * unbias)], axis=0)


def _head_eval_kernel(x_ref, w_ref, b_ref, feat_ref):
    """forward(x, train=False) with BN1 (running stats) pre-folded into fc1."""
    feat_ref[...] = (
        jnp.dot(x_ref[...].astype(jnp.bfloat16), w_ref[...],
                preferred_element_type=jnp.float32)
        + b_ref[...]
    )


# ----------------------------------------------------------------------------
# Wrappers
# ----------------------------------------------------------------------------
_VMEM_SPEC = pl.BlockSpec(memory_space=pltpu.MemorySpace.VMEM)


def _nbytes(arrs):
    return sum(int(np.prod(a.shape)) * jnp.dtype(a.dtype).itemsize for a in arrs)


def _vmem_limit(args, outs):
    total = _nbytes(args) + _nbytes(outs)
    try:
        phys = int(pltpu.get_tpu_info().vmem_capacity_bytes)
    except Exception:  # pragma: no cover - conservative fallback
        phys = 64 << 20
    ceiling = min(phys // 2, 32 << 20)   # <=32 MiB; leaves headroom even on v7x
    return int(min(max(3 * total, 8 << 20), ceiling))


def pack_train_params(params):
    """One-time packing: persistent bf16 weight copies + packed (5, D) 1-D params.

    Do this once at init / after each optimizer step, NOT per forward call.
    """
    p1 = jnp.concatenate(
        [params["b1"], params["bn1_gamma"], params["bn1_beta"],
         params["bn1_mean"], params["bn1_var"]], axis=0)                  # (5, H)
    p2 = jnp.concatenate(
        [params["b2"], params["bn2_gamma"], params["bn2_beta"],
         params["bn2_mean"], params["bn2_var"]], axis=0)                  # (5, C)
    return {
        "w1": params["w1"].astype(jnp.bfloat16),
        "p1": p1.astype(jnp.float32),
        "w2": params["w2"].astype(jnp.bfloat16),
        "p2": p2.astype(jnp.float32),
    }


def pack_eval_params(params):
    """One-time eval prep: fold BN1 running stats into fc1, cache bf16 folded weight."""
    scale = params["bn1_gamma"] * jax.lax.rsqrt(params["bn1_var"] + BN_EPS)   # (1, H)
    w_fold = (params["w1"] * scale).astype(jnp.bfloat16)                      # (Cin, H)
    b_fold = (params["b1"] - params["bn1_mean"]) * scale + params["bn1_beta"] # (1, H)
    return {"w_fold": w_fold, "b_fold": b_fold.astype(jnp.float32)}


def baseline_forward_train(x, packed):
    """x: (B, Cin) backbone features, packed: output of pack_train_params.

    Returns (feature (B, H), identity (B, C), stats1 (2, H), stats2 (2, C)) where
    stats rows are the momentum-updated BN running [mean; var] (PyTorch side effect).
    """
    B = x.shape[0]
    cin, hidden = packed["w1"].shape
    num_classes = packed["w2"].shape[1]

    args = (x, packed["w1"], packed["p1"], packed["w2"], packed["p2"])
    out_shapes = (
        jax.ShapeDtypeStruct((B, hidden), jnp.float32),
        jax.ShapeDtypeStruct((B, num_classes), jnp.float32),
        jax.ShapeDtypeStruct((2, hidden), jnp.float32),
        jax.ShapeDtypeStruct((2, num_classes), jnp.float32),
    )
    flops = 2 * B * (cin * hidden + hidden * num_classes) + 12 * B * (hidden + num_classes)
    return pl.pallas_call(
        _head_train_kernel,
        out_shape=out_shapes,
        in_specs=[_VMEM_SPEC] * len(args),
        out_specs=tuple([_VMEM_SPEC] * len(out_shapes)),
        compiler_params=pltpu.CompilerParams(
            vmem_limit_bytes=_vmem_limit(args, out_shapes)
        ),
        cost_estimate=pl.CostEstimate(
            flops=flops,
            transcendentals=hidden + num_classes,
            bytes_accessed=_nbytes(args) + _nbytes(out_shapes),
        ),
    )(*args)


def baseline_forward_eval(x, packed_eval):
    """x: (B, Cin) backbone features, packed_eval: output of pack_eval_params.

    Returns feature (B, H): BN1 (eval mode, running stats) folded into fc1, so the
    kernel is a single bf16 matmul + f32 bias.
    """
    B = x.shape[0]
    cin, hidden = packed_eval["w_fold"].shape

    args = (x, packed_eval["w_fold"], packed_eval["b_fold"])
    out_shape = jax.ShapeDtypeStruct((B, hidden), jnp.float32)
    return pl.pallas_call(
        _head_eval_kernel,
        out_shape=out_shape,
        in_specs=[_VMEM_SPEC] * len(args),
        out_specs=_VMEM_SPEC,
        compiler_params=pltpu.CompilerParams(
            vmem_limit_bytes=_vmem_limit(args, (out_shape,))
        ),
        cost_estimate=pl.CostEstimate(
            flops=2 * B * cin * hidden + B * hidden,
            transcendentals=0,
            bytes_accessed=_nbytes(args) + _nbytes((out_shape,)),
        ),
    )(*args)


# ----------------------------------------------------------------------------
# Deterministic parameter init (shapes from BaseLine.__init__; f32 masters)
# ----------------------------------------------------------------------------
def init_params(key, out_channels, hidden, num_classes):
    k1, k2, k3, k4 = jax.random.split(key, 4)
    lim1 = 1.0 / np.sqrt(out_channels)
    lim2 = 1.0 / np.sqrt(hidden)
    # 1-D params kept as (1, D) so the last dim sits on the lane axis.
    return {
        "w1": jax.random.uniform(k1, (out_channels, hidden), jnp.float32, -lim1, lim1),
        "b1": jax.random.uniform(k2, (1, hidden), jnp.float32, -lim1, lim1),
        "bn1_gamma": jnp.ones((1, hidden), jnp.float32),
        "bn1_beta": jnp.zeros((1, hidden), jnp.float32),
        "bn1_mean": jnp.zeros((1, hidden), jnp.float32),
        "bn1_var": jnp.ones((1, hidden), jnp.float32),
        "w2": jax.random.uniform(k3, (hidden, num_classes), jnp.float32, -lim2, lim2),
        "b2": jax.random.uniform(k4, (1, num_classes), jnp.float32, -lim2, lim2),
        "bn2_gamma": jnp.ones((1, num_classes), jnp.float32),
        "bn2_beta": jnp.zeros((1, num_classes), jnp.float32),
        "bn2_mean": jnp.zeros((1, num_classes), jnp.float32),
        "bn2_var": jnp.ones((1, num_classes), jnp.float32),
    }


# ----------------------------------------------------------------------------
# Pure-JAX references (same precision policy: bf16 matmul inputs, f32 math)
# ----------------------------------------------------------------------------
def _bdot(a, b):
    return jnp.dot(a.astype(jnp.bfloat16), b.astype(jnp.bfloat16),
                   preferred_element_type=jnp.float32)


def _ref_train(x, p):
    h1 = _bdot(x, p["w1"]) + p["b1"]
    m1 = jnp.mean(h1, axis=0, keepdims=True)
    v1 = jnp.mean((h1 - m1) ** 2, axis=0, keepdims=True)
    feat = p["bn1_gamma"] * (h1 - m1) / jnp.sqrt(v1 + BN_EPS) + p["bn1_beta"]
    h2 = _bdot(feat, p["w2"]) + p["b2"]
    m2 = jnp.mean(h2, axis=0, keepdims=True)
    v2 = jnp.mean((h2 - m2) ** 2, axis=0, keepdims=True)
    ident = p["bn2_gamma"] * (h2 - m2) / jnp.sqrt(v2 + BN_EPS) + p["bn2_beta"]
    return feat, ident, m1, v1, m2, v2


def _ref_eval(x, p):
    scale = p["bn1_gamma"] / jnp.sqrt(p["bn1_var"] + BN_EPS)
    h1 = _bdot(x, p["w1"] * scale)
    b = (p["b1"] - p["bn1_mean"]) * scale + p["bn1_beta"]
    return h1 + b


if __name__ == "__main__":
    B = 8                 # batch (args.batch_size * num_instances, kept small)
    OUT_CHANNELS = 1280   # EfficientNet-b0 backbone out_channels
    HIDDEN = 512
    NUM_CLASSES = 256     # synthetic number of identities

    key = jax.random.PRNGKey(0)
    kx, kp = jax.random.split(key)
    # Backbone features (stand-in for EfficientNet(NCHW image) output).
    x = jax.random.normal(kx, (B, OUT_CHANNELS), jnp.float32)
    params = init_params(kp, OUT_CHANNELS, HIDDEN, NUM_CLASSES)

    # One-time packing (done at init / after optimizer updates, never per step).
    train_packed = jax.tree_util.tree_map(jax.block_until_ready, pack_train_params(params))
    eval_packed = jax.tree_util.tree_map(jax.block_until_ready, pack_eval_params(params))

    # train=True path: (feature, identity) + fused momentum-updated BN running stats
    feat_t, ident_t, stats1, stats2 = baseline_forward_train(x, train_packed)
    feat_t = jax.block_until_ready(feat_t)
    ident_t = jax.block_until_ready(ident_t)
    stats1 = jax.block_until_ready(stats1)
    stats2 = jax.block_until_ready(stats2)

    # train=False path: feature only (BN1 pre-folded into fc1)
    feat_e = jax.block_until_ready(baseline_forward_eval(x, eval_packed))

    # Correctness vs pure-JAX references (same bf16-matmul / f32-math policy)
    rf, ri, rm1, rv1, rm2, rv2 = _ref_train(x, params)
    rfe = _ref_eval(x, params)
    assert jnp.allclose(feat_t, rf, atol=2e-2, rtol=2e-2)
    assert jnp.allclose(ident_t, ri, atol=2e-2, rtol=2e-2)
    assert jnp.allclose(feat_e, rfe, atol=2e-2, rtol=2e-2)

    unbias = B / (B - 1)
    ref_rm1 = (1 - BN_MOMENTUM) * params["bn1_mean"] + BN_MOMENTUM * rm1
    ref_rv1 = (1 - BN_MOMENTUM) * params["bn1_var"] + BN_MOMENTUM * (rv1 * unbias)
    ref_rm2 = (1 - BN_MOMENTUM) * params["bn2_mean"] + BN_MOMENTUM * rm2
    ref_rv2 = (1 - BN_MOMENTUM) * params["bn2_var"] + BN_MOMENTUM * (rv2 * unbias)
    assert jnp.allclose(stats1[0:1], ref_rm1, atol=2e-2, rtol=2e-2)
    assert jnp.allclose(stats1[1:2], ref_rv1, atol=2e-2, rtol=2e-2)
    assert jnp.allclose(stats2[0:1], ref_rm2, atol=2e-2, rtol=2e-2)
    assert jnp.allclose(stats2[1:2], ref_rv2, atol=2e-2, rtol=2e-2)

    print("KERNEL_OK")
</pallas_src>

<mosaic_0001>
module attributes {stable_mosaic.version = 11 : i64} {
  func.func @_head_train_kernel(%arg0: memref<8x1280xf32, #tpu.memory_space<vmem>>, %arg1: memref<1280x512xbf16, #tpu.memory_space<vmem>>, %arg2: memref<5x512xf32, #tpu.memory_space<vmem>>, %arg3: memref<512x256xbf16, #tpu.memory_space<vmem>>, %arg4: memref<5x256xf32, #tpu.memory_space<vmem>>, %arg5: memref<8x512xf32, #tpu.memory_space<vmem>>, %arg6: memref<8x256xf32, #tpu.memory_space<vmem>>, %arg7: memref<2x512xf32, #tpu.memory_space<vmem>>, %arg8: memref<2x256xf32, #tpu.memory_space<vmem>>) attributes {dimension_semantics = [], scalar_prefetch = 0 : i64, scratch_operands = 0 : i64, tpu.core_type = #tpu.core_type<tc>} {
    %c0 = arith.constant 0 : index
    %c0_0 = arith.constant 0 : index
    %0 = vector.load %arg0[%c0, %c0_0] : memref<8x1280xf32, #tpu.memory_space<vmem>>, vector<8x1280xf32>
    %1 = arith.truncf %0 : vector<8x1280xf32> to vector<8x1280xbf16>
    %c0_1 = arith.constant 0 : index
    %c0_2 = arith.constant 0 : index
    %2 = vector.load %arg1[%c0_1, %c0_2] : memref<1280x512xbf16, #tpu.memory_space<vmem>>, vector<1280x512xbf16>
    %cst = arith.constant dense<0.000000e+00> : vector<8x512xf32>
    %3 = tpu.matmul %1, %2, %cst {dimension_numbers = #tpu.dot_dimension_numbers<[1], [0], [0], [1], [0, 0, 1, 1], [], []>} : vector<8x1280xbf16>, vector<1280x512xbf16>, vector<8x512xf32> -> vector<8x512xf32>
    %c0_3 = arith.constant 0 : index
    %c0_4 = arith.constant 0 : index
    %4 = vector.load %arg2[%c0_3, %c0_4] : memref<5x512xf32, #tpu.memory_space<vmem>>, vector<1x512xf32>
    %5 = vector.broadcast %4 : vector<1x512xf32> to vector<8x512xf32>
    %6 = arith.addf %3, %5 : vector<8x512xf32>
    %cst_5 = arith.constant dense<0.000000e+00> : vector<512xf32>
    %7 = vector.multi_reduction <add>, %6, %cst_5 [0] : vector<8x512xf32> to vector<512xf32>
    %8 = vector.shape_cast %7 : vector<512xf32> to vector<1x512xf32>
    %cst_6 = arith.constant 8.000000e+00 : f32
    %9 = vector.broadcast %cst_6 : f32 to vector<1x512xf32>
    %10 = arith.divf %8, %9 : vector<1x512xf32>
    %11 = vector.broadcast %10 : vector<1x512xf32> to vector<8x512xf32>
    %12 = arith.subf %6, %11 : vector<8x512xf32>
    %13 = arith.mulf %12, %12 : vector<8x512xf32>
    %cst_7 = arith.constant dense<0.000000e+00> : vector<512xf32>
    %14 = vector.multi_reduction <add>, %13, %cst_7 [0] : vector<8x512xf32> to vector<512xf32>
    %15 = vector.shape_cast %14 : vector<512xf32> to vector<1x512xf32>
    %cst_8 = arith.constant 8.000000e+00 : f32
    %16 = vector.broadcast %cst_8 : f32 to vector<1x512xf32>
    %17 = arith.divf %15, %16 : vector<1x512xf32>
    %c1 = arith.constant 1 : index
    %c0_9 = arith.constant 0 : index
    %18 = vector.load %arg2[%c1, %c0_9] : memref<5x512xf32, #tpu.memory_space<vmem>>, vector<1x512xf32>
    %cst_10 = arith.constant 9.99999974E-6 : f32
    %19 = vector.broadcast %cst_10 : f32 to vector<1x512xf32>
    %20 = arith.addf %17, %19 : vector<1x512xf32>
    %21 = math.rsqrt %20 : vector<1x512xf32>
    %22 = arith.mulf %18, %21 : vector<1x512xf32>
    %23 = vector.broadcast %22 : vector<1x512xf32> to vector<8x512xf32>
    %24 = arith.mulf %12, %23 : vector<8x512xf32>
    %c2 = arith.constant 2 : index
    %c0_11 = arith.constant 0 : index
    %25 = vector.load %arg2[%c2, %c0_11] : memref<5x512xf32, #tpu.memory_space<vmem>>, vector<1x512xf32>
    %26 = vector.broadcast %25 : vector<1x512xf32> to vector<8x512xf32>
    %27 = arith.addf %24, %26 : vector<8x512xf32>
    %c0_12 = arith.constant 0 : index
    %c0_13 = arith.constant 0 : index
    %28 = vector.load %arg5[%c0_12, %c0_13] : memref<8x512xf32, #tpu.memory_space<vmem>>, vector<8x512xf32>
    tpu.vector_store %arg5[%c0_12, %c0_13], %27 {strides = array<i32>} : memref<8x512xf32, #tpu.memory_space<vmem>>, vector<8x512xf32>,
    %c3 = arith.constant 3 : index
    %c0_14 = arith.constant 0 : index
    %29 = vector.load %arg2[%c3, %c0_14] : memref<5x512xf32, #tpu.memory_space<vmem>>, vector<1x512xf32>
    %cst_15 = arith.constant 0.899999976 : f32
    %30 = vector.broadcast %cst_15 : f32 to vector<1x512xf32>
    %31 = arith.mulf %30, %29 : vector<1x512xf32>
    %cst_16 = arith.constant 1.000000e-01 : f32
    %32 = vector.broadcast %cst_16 : f32 to vector<1x512xf32>
    %33 = arith.mulf %32, %10 : vector<1x512xf32>
    %34 = arith.addf %31, %33 : vector<1x512xf32>
    %c4 = arith.constant 4 : index
    %c0_17 = arith.constant 0 : index
    %35 = vector.load %arg2[%c4, %c0_17] : memref<5x512xf32, #tpu.memory_space<vmem>>, vector<1x512xf32>
    %cst_18 = arith.constant 0.899999976 : f32
    %36 = vector.broadcast %cst_18 : f32 to vector<1x512xf32>
    %37 = arith.mulf %36, %35 : vector<1x512xf32>
    %cst_19 = arith.constant 1.14285719 : f32
    %38 = vector.broadcast %cst_19 : f32 to vector<1x512xf32>
    %39 = arith.mulf %17, %38 : vector<1x512xf32>
    %cst_20 = arith.constant 1.000000e-01 : f32
    %40 = vector.broadcast %cst_20 : f32 to vector<1x512xf32>
    %41 = arith.mulf %40, %39 : vector<1x512xf32>
    %42 = arith.addf %37, %41 : vector<1x512xf32>
    %43 = tpu.concatenate %34, %42 in 0 : vector<1x512xf32>, vector<1x512xf32> -> vector<2x512xf32>
    %c0_21 = arith.constant 0 : index
    %c0_22 = arith.constant 0 : index
    %44 = vector.load %arg7[%c0_21, %c0_22] : memref<2x512xf32, #tpu.memory_space<vmem>>, vector<2x512xf32>
    tpu.vector_store %arg7[%c0_21, %c0_22], %43 {strides = array<i32>} : memref<2x512xf32, #tpu.memory_space<vmem>>, vector<2x512xf32>,
    %45 = arith.truncf %27 : vector<8x512xf32> to vector<8x512xbf16>
    %c0_23 = arith.constant 0 : index
    %c0_24 = arith.constant 0 : index
    %46 = vector.load %arg3[%c0_23, %c0_24] : memref<512x256xbf16, #tpu.memory_space<vmem>>, vector<512x256xbf16>
    %cst_25 = arith.constant dense<0.000000e+00> : vector<8x256xf32>
    %47 = tpu.matmul %45, %46, %cst_25 {dimension_numbers = #tpu.dot_dimension_numbers<[1], [0], [0], [1], [0, 0, 1, 1], [], []>} : vector<8x512xbf16>, vector<512x256xbf16>, vector<8x256xf32> -> vector<8x256xf32>
    %c0_26 = arith.constant 0 : index
    %c0_27 = arith.constant 0 : index
    %48 = vector.load %arg4[%c0_26, %c0_27] : memref<5x256xf32, #tpu.memory_space<vmem>>, vector<1x256xf32>
    %49 = vector.broadcast %48 : vector<1x256xf32> to vector<8x256xf32>
    %50 = arith.addf %47, %49 : vector<8x256xf32>
    %cst_28 = arith.constant dense<0.000000e+00> : vector<256xf32>
    %51 = vector.multi_reduction <add>, %50, %cst_28 [0] : vector<8x256xf32> to vector<256xf32>
    %52 = vector.shape_cast %51 : vector<256xf32> to vector<1x256xf32>
    %cst_29 = arith.constant 8.000000e+00 : f32
    %53 = vector.broadcast %cst_29 : f32 to vector<1x256xf32>
    %54 = arith.divf %52, %53 : vector<1x256xf32>
    %55 = vector.broadcast %54 : vector<1x256xf32> to vector<8x256xf32>
    %56 = arith.subf %50, %55 : vector<8x256xf32>
    %57 = arith.mulf %56, %56 : vector<8x256xf32>
    %cst_30 = arith.constant dense<0.000000e+00> : vector<256xf32>
    %58 = vector.multi_reduction <add>, %57, %cst_30 [0] : vector<8x256xf32> to vector<256xf32>
    %59 = vector.shape_cast %58 : vector<256xf32> to vector<1x256xf32>
    %cst_31 = arith.constant 8.000000e+00 : f32
    %60 = vector.broadcast %cst_31 : f32 to vector<1x256xf32>
    %61 = arith.divf %59, %60 : vector<1x256xf32>
    %c1_32 = arith.constant 1 : index
    %c0_33 = arith.constant 0 : index
    %62 = vector.load %arg4[%c1_32, %c0_33] : memref<5x256xf32, #tpu.memory_space<vmem>>, vector<1x256xf32>
    %cst_34 = arith.constant 9.99999974E-6 : f32
    %63 = vector.broadcast %cst_34 : f32 to vector<1x256xf32>
    %64 = arith.addf %61, %63 : vector<1x256xf32>
    %65 = math.rsqrt %64 : vector<1x256xf32>
    %66 = arith.mulf %62, %65 : vector<1x256xf32>
    %67 = vector.broadcast %66 : vector<1x256xf32> to vector<8x256xf32>
    %68 = arith.mulf %56, %67 : vector<8x256xf32>
    %c2_35 = arith.constant 2 : index
    %c0_36 = arith.constant 0 : index
    %69 = vector.load %arg4[%c2_35, %c0_36] : memref<5x256xf32, #tpu.memory_space<vmem>>, vector<1x256xf32>
    %70 = vector.broadcast %69 : vector<1x256xf32> to vector<8x256xf32>
    %71 = arith.addf %68, %70 : vector<8x256xf32>
    %c0_37 = arith.constant 0 : index
    %c0_38 = arith.constant 0 : index
    %72 = vector.load %arg6[%c0_37, %c0_38] : memref<8x256xf32, #tpu.memory_space<vmem>>, vector<8x256xf32>
    tpu.vector_store %arg6[%c0_37, %c0_38], %71 {strides = array<i32>} : memref<8x256xf32, #tpu.memory_space<vmem>>, vector<8x256xf32>,
    %c3_39 = arith.constant 3 : index
    %c0_40 = arith.constant 0 : index
    %73 = vector.load %arg4[%c3_39, %c0_40] : memref<5x256xf32, #tpu.memory_space<vmem>>, vector<1x256xf32>
    %cst_41 = arith.constant 0.899999976 : f32
    %74 = vector.broadcast %cst_41 : f32 to vector<1x256xf32>
    %75 = arith.mulf %74, %73 : vector<1x256xf32>
    %cst_42 = arith.constant 1.000000e-01 : f32
    %76 = vector.broadcast %cst_42 : f32 to vector<1x256xf32>
    %77 = arith.mulf %76, %54 : vector<1x256xf32>
    %78 = arith.addf %75, %77 : vector<1x256xf32>
    %c4_43 = arith.constant 4 : index
    %c0_44 = arith.constant 0 : index
    %79 = vector.load %arg4[%c4_43, %c0_44] : memref<5x256xf32, #tpu.memory_space<vmem>>, vector<1x256xf32>
    %cst_45 = arith.constant 0.899999976 : f32
    %80 = vector.broadcast %cst_45 : f32 to vector<1x256xf32>
    %81 = arith.mulf %80, %79 : vector<1x256xf32>
    %cst_46 = arith.constant 1.14285719 : f32
    %82 = vector.broadcast %cst_46 : f32 to vector<1x256xf32>
    %83 = arith.mulf %61, %82 : vector<1x256xf32>
    %cst_47 = arith.constant 1.000000e-01 : f32
    %84 = vector.broadcast %cst_47 : f32 to vector<1x256xf32>
    %85 = arith.mulf %84, %83 : vector<1x256xf32>
    %86 = arith.addf %81, %85 : vector<1x256xf32>
    %87 = tpu.concatenate %78, %86 in 0 : vector<1x256xf32>, vector<1x256xf32> -> vector<2x256xf32>
    %c0_48 = arith.constant 0 : index
    %c0_49 = arith.constant 0 : index
    %88 = vector.load %arg8[%c0_48, %c0_49] : memref<2x256xf32, #tpu.memory_space<vmem>>, vector<2x256xf32>
    tpu.vector_store %arg8[%c0_48, %c0_49], %87 {strides = array<i32>} : memref<2x256xf32, #tpu.memory_space<vmem>>, vector<2x256xf32>,
    return
  }
}

</mosaic_0001>

<bundles_post_ra>
// kernel: tpu_custom_call.1
= control target key start
LH: loop header
LB: loop body
LE: loop exit
PB: predicated region body
PF: predicated region fallthrough
CT: control target
= control target key end

     0   :  { %14 = vsyncpa [#allocation3], 0  ;;  %s5072_s0 = inlined_call_operand.hbm [shape: f32[8,1280], index: 0, kind: input, shape index: {}]   ;;  %s5073_s1 = inlined_call_operand.hbm [shape: bf16[1280,512], index: 1, kind: input, shape index: {}]   ;;  %s5074_s2 = inlined_call_operand.hbm [shape: f32[5,512], index: 2, kind: input, shape index: {}]   ;;  %s5075_s3 = inlined_call_operand.hbm [shape: bf16[512,256], index: 3, kind: input, shape index: {}]   ;;  %s5076_s4 = inlined_call_operand.hbm [shape: f32[5,256], index: 4, kind: input, shape index: {}]   ;;  %s5077_s5 = inlined_call_operand.hbm [shape: f32[8,512], index: 5, kind: output, shape index: {0}]   ;;  %s5078_s6 = inlined_call_operand.hbm [shape: f32[8,256], index: 6, kind: output, shape index: {1}]   ;;  %s5079_s7 = inlined_call_operand.hbm [shape: f32[2,512], index: 7, kind: output, shape index: {2}]   ;;  %s5080_s8 = inlined_call_operand.hbm [shape: f32[2,256], index: 8, kind: output, shape index: {3}]  }
   0x1   :  { %15 = vsyncpa [#allocation6], 0 }
   0x2   :  { %16 = vsyncpa [#allocation9], 0 }
   0x3   :  { %17 = vsyncpa [#allocation4], 0 }
   0x4   :  { %18 = vsyncpa [#allocation13], 0 }
   0x5   :  { %19 = vsyncpa [#allocation16], 0  ;;  %s4721_s27 = smov [#allocation5]   ;;  %s4511_s9 = scalar_lea.hbm %s5073_s1, 40960 }
   0x6   :  { %s35_s28 = sshll.u32 %s4721_s27, 4  ;;  %p4512_p0 = scmp.ne.s32.totalorder %s5073_s1, %s4511_s9  ;;  %s36_s28 = int_to_ptr.vmem [resolvable:$true] %s35_s28 }
   0x7   :  { %p4515_p1 = scmp.lt.u32.totalorder %s4511_s9, %s5073_s1 }
   0x9   :  { %p4517_p2 = pnand %p4515_p1, %p4512_p0 }
   0xb   :  { %4520 = shalt.err (!%p4517_p2)
}
   0xc   :  { %s4521_s14 = scalar_lea.vmem %s36_s28, 40960  ;;  %p4526_p4 = scmp.lt.s32.totalorder %s36_s28, %s36_s28 }
   0xd   :  { %p4522_p3 = scmp.ne.s32.totalorder %s36_s28, %s4521_s14  ;;  %p4527_p5 = scmp.lt.s32.totalorder %s4521_s14, %s4521_s14 }
   0xf   :  { %p4528_p6 = por %p4527_p5, %p4526_p4 }
  0x11   :  { %p4529_p7 = pnand %p4528_p6, %p4522_p3 }
  0x13   :  { %4532 = shalt.err (!%p4529_p7)
}
  0x14   :  { %s4722_s15 = smov 256   ;;  %s4723_s16 = smov 16  }
  0x15   :  { %41 = dma.hbm_to_vmem [thread:$0]  %s5073_s1, 40960, %s36_s28, [#allocation6], %s4722_s15, %s4722_s15, %s4723_s16  }
  0x16   :  { %s4724_s19 = smov [#allocation8]   ;;  %s4533_s23 = scalar_lea.hbm %s5075_s3, 8192 }
  0x17   :  { %s57_s20 = sshll.u32 %s4724_s19, 4  ;;  %p4534_p8 = scmp.ne.s32.totalorder %s5075_s3, %s4533_s23  ;;  %s58_s20 = int_to_ptr.vmem [resolvable:$true] %s57_s20 }
  0x18   :  { %p4537_p9 = scmp.lt.u32.totalorder %s4533_s23, %s5075_s3 }
  0x1a   :  { %p4539_p10 = pnand %p4537_p9, %p4534_p8 }
  0x1c   :  { %4542 = shalt.err (!%p4539_p10)
}
  0x1d   :  { %s4543_s29 = scalar_lea.vmem %s58_s20, 8192  ;;  %p4548_p12 = scmp.lt.s32.totalorder %s58_s20, %s58_s20 }
  0x1e   :  { %p4544_p11 = scmp.ne.s32.totalorder %s58_s20, %s4543_s29  ;;  %p4549_p13 = scmp.lt.s32.totalorder %s4543_s29, %s4543_s29 }
  0x20   :  { %p4550_p0 = por %p4549_p13, %p4548_p12 }
  0x22   :  { %p4551_p1 = pnand %p4550_p0, %p4544_p11 }
  0x24   :  { %4554 = shalt.err (!%p4551_p1)
}
  0x25   :  { %s4725_s1 = smov 128   ;;  %s4726_s28 = smov 8  }
  0x26   :  { %63 = dma.hbm_to_vmem [thread:$0]  %s5075_s3, 8192, %s58_s20, [#allocation9], %s4725_s1, %s4725_s1, %s4726_s28  }
  0x27   :  { %s4727_s10 = smov [#allocation2]   ;;  %s4728_s12 = smov [#allocation7]  }
  0x28   :  { %s26_s11 = sshll.u32 %s4727_s10, 4  ;;  %s48_s13 = sshll.u32 %s4728_s12, 4  ;;  %s27_s11 = int_to_ptr.vmem [resolvable:$true] %s26_s11  ;;  %s49_s13 = int_to_ptr.vmem [resolvable:$true] %s48_s13 }
  0x29   :  { %s4555_s16 = scalar_lea.hbm %s5072_s0, 1280 }
  0x2a   :  { %p4556_p2 = scmp.ne.s32.totalorder %s5072_s0, %s4555_s16  ;;  %p4559_p3 = scmp.lt.u32.totalorder %s4555_s16, %s5072_s0 }
  0x2c   :  { %p4561_p4 = pnand %p4559_p3, %p4556_p2 }
  0x2e   :  { %4564 = shalt.err (!%p4561_p4)
}
  0x2f   :  { %s4565_s3 = scalar_lea.vmem %s27_s11, 1280  ;;  %p4570_p6 = scmp.lt.s32.totalorder %s27_s11, %s27_s11 }
  0x30   :  { %p4566_p5 = scmp.ne.s32.totalorder %s27_s11, %s4565_s3  ;;  %p4571_p7 = scmp.lt.s32.totalorder %s4565_s3, %s4565_s3 }
  0x32   :  { %p4572_p8 = por %p4571_p7, %p4570_p6 }
  0x34   :  { %p4573_p9 = pnand %p4572_p8, %p4566_p5 }
  0x36   :  { %4576 = shalt.err (!%p4573_p9)
}
  0x37   :  { %29 = dma.hbm_to_vmem [thread:$0]  %s5072_s0, 1280, %s27_s11, [#allocation3]  }
  0x38   :  { %s4577_s25 = scalar_lea.hbm %s5074_s2, 512 }
  0x39   :  { %p4578_p10 = scmp.ne.s32.totalorder %s5074_s2, %s4577_s25  ;;  %p4581_p11 = scmp.lt.u32.totalorder %s4577_s25, %s5074_s2 }
  0x3b   :  { %p4583_p12 = pnand %p4581_p11, %p4578_p10 }
  0x3d   :  { %4586 = shalt.err (!%p4583_p12)
}
  0x3e   :  { %s4587_s28 = scalar_lea.vmem %s49_s13, 512  ;;  %p4592_p0 = scmp.lt.s32.totalorder %s49_s13, %s49_s13 }
  0x3f   :  { %p4588_p13 = scmp.ne.s32.totalorder %s49_s13, %s4587_s28  ;;  %p4593_p1 = scmp.lt.s32.totalorder %s4587_s28, %s4587_s28 }
  0x41   :  { %p4594_p2 = por %p4593_p1, %p4592_p0 }
  0x43   :  { %p4595_p3 = pnand %p4594_p2, %p4588_p13 }
  0x45   :  { %4598 = shalt.err (!%p4595_p3)
}
  0x46   :  { %51 = dma.hbm_to_vmem [thread:$0]  %s5074_s2, 512, %s49_s13, [#allocation6]  }
  0x47   :  { %s4729_s9 = smov [#allocation10]   ;;  %s4599_s14 = scalar_lea.hbm %s5076_s4, 256 }
  0x48   :  { %s70_s10 = sshll.u32 %s4729_s9, 4  ;;  %p4600_p4 = scmp.ne.s32.totalorder %s5076_s4, %s4599_s14  ;;  %s71_s10 = int_to_ptr.vmem [resolvable:$true] %s70_s10 }
  0x49   :  { %p4603_p5 = scmp.lt.u32.totalorder %s4599_s14, %s5076_s4 }
  0x4b   :  { %p4605_p6 = pnand %p4603_p5, %p4600_p4 }
  0x4d   :  { %4608 = shalt.err (!%p4605_p6)
}
  0x4e   :  { %s4609_s19 = scalar_lea.vmem %s71_s10, 256  ;;  %p4614_p8 = scmp.lt.s32.totalorder %s71_s10, %s71_s10 }
  0x4f   :  { %p4610_p7 = scmp.ne.s32.totalorder %s71_s10, %s4609_s19  ;;  %p4615_p9 = scmp.lt.s32.totalorder %s4609_s19, %s4609_s19 }
  0x51   :  { %p4616_p10 = por %p4615_p9, %p4614_p8 }
  0x53   :  { %p4617_p11 = pnand %p4616_p10, %p4610_p7 }
  0x55   :  { %4620 = shalt.err (!%p4617_p11)
}
  0x56   :  { %73 = dma.hbm_to_vmem [thread:$0]  %s5076_s4, 256, %s71_s10, [#allocation9]  }
  0x57   :  { %4709 = dma.done.wait [#allocation3], 1280  }
  0x58   :  { %4710 = vsyncadd [#allocation3], 4294966016 }
  0x59   :  { %4711 = dma.done.wait [#allocation6], 41472  }
  0x5a   :  { %4712 = vsyncadd [#allocation6], 4294925824 }
  0x5b   :  { %4713 = dma.done.wait [#allocation9], 8448  }
  0x5c   :  { %4714 = vsyncadd [#allocation9], 4294958848  ;;  %v3923_v0 = vld [vmem:[#allocation5 + $0x4] ss:$16 sps:$4 sm:$0xff]   ;;  %v3927_v2 = vld [vmem:[#allocation5] ss:$16 sps:$4 sm:$0xff]  }
  0x5d   :  { %v3925_v1 = vld [vmem:[#allocation5 + $0x204] ss:$16 sps:$4 sm:$0xff]   ;;  %2051 = vmatprep.subr.bf16.mxu1 %v3923_v0  ;;  %v3928_v3 = vld [vmem:[#allocation5 + $0x200] ss:$16 sps:$4 sm:$0xff]   ;;  %v90_v46 = vld [vmem:[#allocation2 + $0x8] sm:$0xff]  ;;  %vm2742_vm0 = vcmask 1040384  }
  0x5e   :  { %2092 = vmatprep.subr.bf16.mxu0 %v3925_v1  ;;  %v3929_v4 = vld [vmem:[#allocation5 + $0x24] ss:$16 sps:$4 sm:$0xff]   ;;  %2052 = vmatpush1.bf16.msra.mxu1 %v3927_v2  ;;  %v3933_v6 = vld [vmem:[#allocation5 + $0x20] ss:$16 sps:$4 sm:$0xff]   ;;  %v4841_v48 = vpack.c.bf16 %v90_v46, %v90_v46  ;;  %v92_v49 = vld [vmem:[#allocation2 + $0x18] sm:$0xff]  ;;  %s4732_s4 = smov [#allocation11]  }
  0x5f   :  { %2093 = vmatpush1.bf16.msra.mxu0 %v3928_v3  ;;  %v3931_v5 = vld [vmem:[#allocation5 + $0x224] ss:$16 sps:$4 sm:$0xff]   ;;  %2053 = vmatprep.subr.bf16.mxu1 %v3929_v4  ;;  %v3934_v7 = vld [vmem:[#allocation5 + $0x220] ss:$16 sps:$4 sm:$0xff]   ;;  %v4843_v52 = vpack.c.bf16 %v92_v49, %v92_v49  ;;  %v4076_v49 = vld [vmem:[#allocation5 + $0x128] ss:$16 sps:$4 sm:$0xff]  }
  0x60   :  { %2094 = vmatprep.subr.bf16.mxu0 %v3931_v5  ;;  %v3935_v8 = vld [vmem:[#allocation5 + $0x44] ss:$16 sps:$4 sm:$0xff]   ;;  %v3939_v10 = vld [vmem:[#allocation5 + $0x40] ss:$16 sps:$4 sm:$0xff]   ;;  %2083 = vmatprep.mubr.bf16.mxu1 %v4841_v48  ;;  %s3431_s21 = sshll.u32 %s4732_s4, 4  ;;  %s3432_s21 = int_to_ptr.vmem [resolvable:$true] %s3431_s21 }
  0x61   :  { %v3937_v9 = vld [vmem:[#allocation5 + $0x244] ss:$16 sps:$4 sm:$0xff]   ;;  %v3940_v11 = vld [vmem:[#allocation5 + $0x240] ss:$16 sps:$4 sm:$0xff]   ;;  %2124 = vmatprep.mubr.bf16.mxu0 %v4843_v52  ;;  %s4621_s3 = scalar_lea.vmem %s3432_s21, 512  ;;  %p4626_p13 = scmp.lt.s32.totalorder %s3432_s21, %s3432_s21 }
  0x62   :  { %2054 = vmatpush1.bf16.msra.mxu1 %v3933_v6  ;;  %v3941_v12 = vld [vmem:[#allocation5 + $0x64] ss:$16 sps:$4 sm:$0xff]   ;;  %v3945_v14 = vld [vmem:[#allocation5 + $0x60] ss:$16 sps:$4 sm:$0xff]   ;;  %p4622_p12 = scmp.ne.s32.totalorder %s3432_s21, %s4621_s3  ;;  %p4627_p0 = scmp.lt.s32.totalorder %s4621_s3, %s4621_s3 }
  0x63   :  { %2095 = vmatpush1.bf16.msra.mxu0 %v3934_v7  ;;  %2055 = vmatprep.subr.bf16.mxu1 %v3935_v8  ;;  %v3943_v13 = vld [vmem:[#allocation5 + $0x264] ss:$16 sps:$4 sm:$0xff]   ;;  %v3946_v15 = vld [vmem:[#allocation5 + $0x260] ss:$16 sps:$4 sm:$0xff]   ;;  %v4024_v7 = vld [vmem:[#allocation5 + $0xc] ss:$16 sps:$4 sm:$0xff]  }
  0x64   :  { %2096 = vmatprep.subr.bf16.mxu0 %v3937_v9  ;;  %v3947_v16 = vld [vmem:[#allocation5 + $0x84] ss:$16 sps:$4 sm:$0xff]   ;;  %v3951_v18 = vld [vmem:[#allocation5 + $0x80] ss:$16 sps:$4 sm:$0xff]   ;;  %p4628_p1 = por %p4627_p0, %p4626_p13 }
  0x65   :  { %v3949_v17 = vld [vmem:[#allocation5 + $0x284] ss:$16 sps:$4 sm:$0xff]   ;;  %v3952_v19 = vld [vmem:[#allocation5 + $0x280] ss:$16 sps:$4 sm:$0xff]  }
  0x66   :  { %2056 = vmatpush1.bf16.msra.mxu1 %v3939_v10  ;;  %v3953_v20 = vld [vmem:[#allocation5 + $0xa4] ss:$16 sps:$4 sm:$0xff]   ;;  %v3957_v22 = vld [vmem:[#allocation5 + $0xa0] ss:$16 sps:$4 sm:$0xff]   ;;  %v4022_v10 = vld [vmem:[#allocation5 + $0x8] ss:$16 sps:$4 sm:$0xff]   ;;  %p4629_p2 = pnand %p4628_p1, %p4622_p12 }
  0x67   :  { %2097 = vmatpush1.bf16.msra.mxu0 %v3940_v11  ;;  %2057 = vmatprep.subr.bf16.mxu1 %v3941_v12  ;;  %v3955_v21 = vld [vmem:[#allocation5 + $0x2a4] ss:$16 sps:$4 sm:$0xff]   ;;  %v3958_v23 = vld [vmem:[#allocation5 + $0x2a0] ss:$16 sps:$4 sm:$0xff]  }
  0x68   :  { %2098 = vmatprep.subr.bf16.mxu0 %v3943_v13  ;;  %v3959_v24 = vld [vmem:[#allocation5 + $0xc4] ss:$16 sps:$4 sm:$0xff]   ;;  %v3963_v26 = vld [vmem:[#allocation5 + $0xc0] ss:$16 sps:$4 sm:$0xff]   ;;  %v4030_v13 = vld [vmem:[#allocation5 + $0x2c] ss:$16 sps:$4 sm:$0xff]  }
  0x69   :  { %v3961_v25 = vld [vmem:[#allocation5 + $0x2c4] ss:$16 sps:$4 sm:$0xff]   ;;  %v3964_v27 = vld [vmem:[#allocation5 + $0x2c0] ss:$16 sps:$4 sm:$0xff]  }
  0x6a   :  { %2058 = vmatpush1.bf16.msra.mxu1 %v3945_v14  ;;  %v3965_v28 = vld [vmem:[#allocation5 + $0xe4] ss:$16 sps:$4 sm:$0xff]   ;;  %v3969_v30 = vld [vmem:[#allocation5 + $0xe0] ss:$16 sps:$4 sm:$0xff]  }
  0x6b   :  { %2099 = vmatpush1.bf16.msra.mxu0 %v3946_v15  ;;  %2059 = vmatprep.subr.bf16.mxu1 %v3947_v16  ;;  %v3967_v29 = vld [vmem:[#allocation5 + $0x2e4] ss:$16 sps:$4 sm:$0xff]   ;;  %v3970_v31 = vld [vmem:[#allocation5 + $0x2e0] ss:$16 sps:$4 sm:$0xff]   ;;  %v4028_v15 = vld [vmem:[#allocation5 + $0x28] ss:$16 sps:$4 sm:$0xff]  }
  0x6c   :  { %2100 = vmatprep.subr.bf16.mxu0 %v3949_v17  ;;  %v3971_v32 = vld [vmem:[#allocation5 + $0x104] ss:$16 sps:$4 sm:$0xff]   ;;  %v3975_v34 = vld [vmem:[#allocation5 + $0x100] ss:$16 sps:$4 sm:$0xff]   ;;  %v4036_v17 = vld [vmem:[#allocation5 + $0x4c] ss:$16 sps:$4 sm:$0xff]  }
  0x6d   :  { %v3973_v33 = vld [vmem:[#allocation5 + $0x304] ss:$16 sps:$4 sm:$0xff]   ;;  %v3976_v35 = vld [vmem:[#allocation5 + $0x300] ss:$16 sps:$4 sm:$0xff]  }
  0x6e   :  { %2060 = vmatpush1.bf16.msra.mxu1 %v3951_v18  ;;  %v3977_v36 = vld [vmem:[#allocation5 + $0x124] ss:$16 sps:$4 sm:$0xff]   ;;  %v3981_v38 = vld [vmem:[#allocation5 + $0x120] ss:$16 sps:$4 sm:$0xff]  }
  0x6f   :  { %2101 = vmatpush1.bf16.msra.mxu0 %v3952_v19  ;;  %2061 = vmatprep.subr.bf16.mxu1 %v3953_v20  ;;  %v3979_v37 = vld [vmem:[#allocation5 + $0x324] ss:$16 sps:$4 sm:$0xff]   ;;  %v3982_v39 = vld [vmem:[#allocation5 + $0x320] ss:$16 sps:$4 sm:$0xff]   ;;  %v4034_v19 = vld [vmem:[#allocation5 + $0x48] ss:$16 sps:$4 sm:$0xff]  }
  0x70   :  { %2102 = vmatprep.subr.bf16.mxu0 %v3955_v21  ;;  %v3983_v40 = vld [vmem:[#allocation5 + $0x144] ss:$16 sps:$4 sm:$0xff]   ;;  %v3987_v42 = vld [vmem:[#allocation5 + $0x140] ss:$16 sps:$4 sm:$0xff]   ;;  %v4042_v21 = vld [vmem:[#allocation5 + $0x6c] ss:$16 sps:$4 sm:$0xff]  }
  0x71   :  { %v3985_v41 = vld [vmem:[#allocation5 + $0x344] ss:$16 sps:$4 sm:$0xff]   ;;  %v3988_v43 = vld [vmem:[#allocation5 + $0x340] ss:$16 sps:$4 sm:$0xff]  }
  0x72   :  { %2062 = vmatpush1.bf16.msra.mxu1 %v3957_v22  ;;  %v3989_v44 = vld [vmem:[#allocation5 + $0x164] ss:$16 sps:$4 sm:$0xff]   ;;  %v3993_v47 = vld [vmem:[#allocation5 + $0x160] ss:$16 sps:$4 sm:$0xff]  }
  0x73   :  { %2103 = vmatpush1.bf16.msra.mxu0 %v3958_v23  ;;  %2063 = vmatprep.subr.bf16.mxu1 %v3959_v24  ;;  %v3991_v45 = vld [vmem:[#allocation5 + $0x364] ss:$16 sps:$4 sm:$0xff]   ;;  %v3994_v50 = vld [vmem:[#allocation5 + $0x360] ss:$16 sps:$4 sm:$0xff]   ;;  %v4040_v23 = vld [vmem:[#allocation5 + $0x68] ss:$16 sps:$4 sm:$0xff]  }
  0x74   :  { %2104 = vmatprep.subr.bf16.mxu0 %v3961_v25  ;;  %v3995_v51 = vld [vmem:[#allocation5 + $0x184] ss:$16 sps:$4 sm:$0xff]   ;;  %v3999_v54 = vld [vmem:[#allocation5 + $0x180] ss:$16 sps:$4 sm:$0xff]   ;;  %v4048_v25 = vld [vmem:[#allocation5 + $0x8c] ss:$16 sps:$4 sm:$0xff]  }
  0x75   :  { %v3997_v53 = vld [vmem:[#allocation5 + $0x384] ss:$16 sps:$4 sm:$0xff]   ;;  %v4000_v55 = vld [vmem:[#allocation5 + $0x380] ss:$16 sps:$4 sm:$0xff]  }
  0x76   :  { %2064 = vmatpush1.bf16.msra.mxu1 %v3963_v26  ;;  %v4001_v56 = vld [vmem:[#allocation5 + $0x1a4] ss:$16 sps:$4 sm:$0xff]   ;;  %v4005_v58 = vld [vmem:[#allocation5 + $0x1a0] ss:$16 sps:$4 sm:$0xff]  }
  0x77   :  { %2105 = vmatpush1.bf16.msra.mxu0 %v3964_v27  ;;  %2065 = vmatprep.subr.bf16.mxu1 %v3965_v28  ;;  %v4003_v57 = vld [vmem:[#allocation5 + $0x3a4] ss:$16 sps:$4 sm:$0xff]   ;;  %v4006_v59 = vld [vmem:[#allocation5 + $0x3a0] ss:$16 sps:$4 sm:$0xff]   ;;  %v4046_v27 = vld [vmem:[#allocation5 + $0x88] ss:$16 sps:$4 sm:$0xff]  }
  0x78   :  { %2106 = vmatprep.subr.bf16.mxu0 %v3967_v29  ;;  %v4007_v60 = vld [vmem:[#allocation5 + $0x1c4] ss:$16 sps:$4 sm:$0xff]   ;;  %v4011_v62 = vld [vmem:[#allocation5 + $0x1c0] ss:$16 sps:$4 sm:$0xff]   ;;  %v4054_v29 = vld [vmem:[#allocation5 + $0xac] ss:$16 sps:$4 sm:$0xff]  }
  0x79   :  { %v4009_v61 = vld [vmem:[#allocation5 + $0x3c4] ss:$16 sps:$4 sm:$0xff]   ;;  %v4012_v63 = vld [vmem:[#allocation5 + $0x3c0] ss:$16 sps:$4 sm:$0xff]  }
  0x7a   :  { %2066 = vmatpush1.bf16.msra.mxu1 %v3969_v30  ;;  %v4013_v0 = vld [vmem:[#allocation5 + $0x1e4] ss:$16 sps:$4 sm:$0xff]   ;;  %v4017_v2 = vld [vmem:[#allocation5 + $0x1e0] ss:$16 sps:$4 sm:$0xff]  }
  0x7b   :  { %2107 = vmatpush1.bf16.msra.mxu0 %v3970_v31  ;;  %2067 = vmatprep.subr.bf16.mxu1 %v3971_v32  ;;  %v4015_v1 = vld [vmem:[#allocation5 + $0x3e4] ss:$16 sps:$4 sm:$0xff]   ;;  %v4018_v3 = vld [vmem:[#allocation5 + $0x3e0] ss:$16 sps:$4 sm:$0xff]   ;;  %v4052_v31 = vld [vmem:[#allocation5 + $0xa8] ss:$16 sps:$4 sm:$0xff]  }
  0x7c   :  { %2108 = vmatprep.subr.bf16.mxu0 %v3973_v33  ;;  %v89_v4 = vld [vmem:[#allocation2] sm:$0xff]  ;;  %v91_v6 = vld [vmem:[#allocation2 + $0x10] sm:$0xff]  ;;  %v4060_v33 = vld [vmem:[#allocation5 + $0xcc] ss:$16 sps:$4 sm:$0xff]  }
  0x7d   :  { %v4021_v5 = vld [vmem:[#allocation5 + $0x404] ss:$16 sps:$4 sm:$0xff]   ;;  %v4847_v8 = vpack.c.bf16 %v89_v4, %v89_v4  ;;  %v4019_v9 = vld [vmem:[#allocation5 + $0x400] ss:$16 sps:$4 sm:$0xff]   ;;  %v4849_v11 = vpack.c.bf16 %v91_v6, %v91_v6  ;;  %v4108_v4 = vld [vmem:[#allocation5 + $0x1cc] ss:$16 sps:$4 sm:$0xff]  }
  0x7e   :  { %2068 = vmatpush1.bf16.msra.mxu1 %v3975_v34  ;;  %v4027_v12 = vld [vmem:[#allocation5 + $0x424] ss:$16 sps:$4 sm:$0xff]   ;;  %v4025_v14 = vld [vmem:[#allocation5 + $0x420] ss:$16 sps:$4 sm:$0xff]   ;;  %v94_v34 = vld [vmem:[#allocation2 + $0x28] sm:$0xff] }
  0x7f   :  { %2109 = vmatpush1.bf16.msra.mxu0 %v3976_v35  ;;  %2069 = vmatprep.subr.bf16.mxu1 %v3977_v36  ;;  %v4033_v16 = vld [vmem:[#allocation5 + $0x444] ss:$16 sps:$4 sm:$0xff]   ;;  %v4031_v18 = vld [vmem:[#allocation5 + $0x440] ss:$16 sps:$4 sm:$0xff]   ;;  %v4854_v36 = vpack.c.bf16 %v94_v34, %v94_v34  ;;  %v4106_v6 = vld [vmem:[#allocation5 + $0x1c8] ss:$16 sps:$4 sm:$0xff]  }
  0x80   :  { %2110 = vmatprep.subr.bf16.mxu0 %v3979_v37  ;;  %v4039_v20 = vld [vmem:[#allocation5 + $0x464] ss:$16 sps:$4 sm:$0xff]   ;;  %v4037_v22 = vld [vmem:[#allocation5 + $0x460] ss:$16 sps:$4 sm:$0xff]   ;;  %v4058_v37 = vld [vmem:[#allocation5 + $0xc8] ss:$16 sps:$4 sm:$0xff]  }
  0x81   :  { %v4045_v24 = vld [vmem:[#allocation5 + $0x484] ss:$16 sps:$4 sm:$0xff]   ;;  %v4043_v26 = vld [vmem:[#allocation5 + $0x480] ss:$16 sps:$4 sm:$0xff]  }
  0x82   :  { %2070 = vmatpush1.bf16.msra.mxu1 %v3981_v38  ;;  %v4051_v28 = vld [vmem:[#allocation5 + $0x4a4] ss:$16 sps:$4 sm:$0xff]   ;;  %v4049_v30 = vld [vmem:[#allocation5 + $0x4a0] ss:$16 sps:$4 sm:$0xff]  }
  0x83   :  { %2111 = vmatpush1.bf16.msra.mxu0 %v3982_v39  ;;  %2071 = vmatprep.subr.bf16.mxu1 %v3983_v40  ;;  %v4057_v32 = vld [vmem:[#allocation5 + $0x4c4] ss:$16 sps:$4 sm:$0xff]   ;;  %v4055_v35 = vld [vmem:[#allocation5 + $0x4c0] ss:$16 sps:$4 sm:$0xff]   ;;  %v4066_v39 = vld [vmem:[#allocation5 + $0xec] ss:$16 sps:$4 sm:$0xff]  }
  0x84   :  { %2112 = vmatprep.subr.bf16.mxu0 %v3985_v41  ;;  %v4063_v38 = vld [vmem:[#allocation5 + $0x4e4] ss:$16 sps:$4 sm:$0xff]   ;;  %v4061_v40 = vld [vmem:[#allocation5 + $0x4e0] ss:$16 sps:$4 sm:$0xff]   ;;  %v4064_v41 = vld [vmem:[#allocation5 + $0xe8] ss:$16 sps:$4 sm:$0xff]  }
  0x85   :  { %v4075_v46 = vld [vmem:[#allocation5 + $0x524] ss:$16 sps:$4 sm:$0xff]   ;;  %v4139_v34 = vld [vmem:[#allocation5 + $0x680] ss:$16 sps:$4 sm:$0xff]  }
  0x86   :  { %2072 = vmatpush1.bf16.msra.mxu1 %v3987_v42  ;;  %v4069_v42 = vld [vmem:[#allocation5 + $0x504] ss:$16 sps:$4 sm:$0xff]  }
  0x87   :  { %2113 = vmatpush1.bf16.msra.mxu0 %v3988_v43  ;;  %2073 = vmatprep.subr.bf16.mxu1 %v3989_v44  ;;  %v4072_v43 = vld [vmem:[#allocation5 + $0x10c] ss:$16 sps:$4 sm:$0xff]   ;;  %v4067_v44 = vld [vmem:[#allocation5 + $0x500] ss:$16 sps:$4 sm:$0xff]  }
  0x88   :  { %2114 = vmatprep.subr.bf16.mxu0 %v3991_v45  ;;  %v4070_v45 = vld [vmem:[#allocation5 + $0x108] ss:$16 sps:$4 sm:$0xff]  }
  0x8a   :  { %2074 = vmatpush1.bf16.msra.mxu1 %v3993_v47  ;;  %v4078_v47 = vld [vmem:[#allocation5 + $0x12c] ss:$16 sps:$4 sm:$0xff]  }
  0x8b   :  { %2115 = vmatpush1.bf16.msra.mxu0 %v3994_v50  ;;  %2075 = vmatprep.subr.bf16.mxu1 %v3995_v51  ;;  %v4081_v50 = vld [vmem:[#allocation5 + $0x544] ss:$16 sps:$4 sm:$0xff]   ;;  %v4084_v51 = vld [vmem:[#allocation5 + $0x14c] ss:$16 sps:$4 sm:$0xff]  }
  0x8c   :  { %2116 = vmatprep.subr.bf16.mxu0 %v3997_v53  ;;  %v4079_v53 = vld [vmem:[#allocation5 + $0x540] ss:$16 sps:$4 sm:$0xff]  }
  0x8e   :  { %2076 = vmatpush1.bf16.msra.mxu1 %v3999_v54  ;;  %v4082_v54 = vld [vmem:[#allocation5 + $0x148] ss:$16 sps:$4 sm:$0xff]  }
  0x8f   :  { %2117 = vmatpush1.bf16.msra.mxu0 %v4000_v55  ;;  %2077 = vmatprep.subr.bf16.mxu1 %v4001_v56  ;;  %v4087_v55 = vld [vmem:[#allocation5 + $0x564] ss:$16 sps:$4 sm:$0xff]   ;;  %v4090_v56 = vld [vmem:[#allocation5 + $0x16c] ss:$16 sps:$4 sm:$0xff]  }
  0x90   :  { %2118 = vmatprep.subr.bf16.mxu0 %v4003_v57  ;;  %v4085_v57 = vld [vmem:[#allocation5 + $0x560] ss:$16 sps:$4 sm:$0xff]  }
  0x92   :  { %2078 = vmatpush1.bf16.msra.mxu1 %v4005_v58  ;;  %v4088_v58 = vld [vmem:[#allocation5 + $0x168] ss:$16 sps:$4 sm:$0xff]  }
  0x93   :  { %2119 = vmatpush1.bf16.msra.mxu0 %v4006_v59  ;;  %2079 = vmatprep.subr.bf16.mxu1 %v4007_v60  ;;  %v4093_v59 = vld [vmem:[#allocation5 + $0x584] ss:$16 sps:$4 sm:$0xff]   ;;  %v4096_v60 = vld [vmem:[#allocation5 + $0x18c] ss:$16 sps:$4 sm:$0xff]  }
  0x94   :  { %2120 = vmatprep.subr.bf16.mxu0 %v4009_v61  ;;  %v4091_v61 = vld [vmem:[#allocation5 + $0x580] ss:$16 sps:$4 sm:$0xff]  }
  0x96   :  { %2080 = vmatpush1.bf16.msra.mxu1 %v4011_v62  ;;  %v4094_v62 = vld [vmem:[#allocation5 + $0x188] ss:$16 sps:$4 sm:$0xff]  }
  0x97   :  { %2121 = vmatpush1.bf16.msra.mxu0 %v4012_v63  ;;  %2081 = vmatprep.subr.bf16.mxu1 %v4013_v0  ;;  %v4099_v63 = vld [vmem:[#allocation5 + $0x5a4] ss:$16 sps:$4 sm:$0xff]   ;;  %v4102_v0 = vld [vmem:[#allocation5 + $0x1ac] ss:$16 sps:$4 sm:$0xff]  }
  0x98   :  { %2122 = vmatprep.subr.bf16.mxu0 %v4015_v1  ;;  %v4097_v1 = vld [vmem:[#allocation5 + $0x5a0] ss:$16 sps:$4 sm:$0xff]  }
  0x9a   :  { %2082 = vmatpush1.bf16.msra.mxu1 %v4017_v2  ;;  %v4100_v2 = vld [vmem:[#allocation5 + $0x1a8] ss:$16 sps:$4 sm:$0xff]  }
  0x9b   :  { %2123 = vmatpush1.bf16.msra.mxu0 %v4018_v3  ;;  %2256 = vmatprep.subr.bf16.mxu1 %v4024_v7  ;;  %v4105_v3 = vld [vmem:[#allocation5 + $0x5c4] ss:$16 sps:$4 sm:$0xff]  }
  0x9c   :  { %2133 = vmatprep.subr.bf16.mxu0 %v4021_v5  ;;  %v4103_v5 = vld [vmem:[#allocation5 + $0x5c0] ss:$16 sps:$4 sm:$0xff]   ;;  %v4111_v7 = vld [vmem:[#allocation5 + $0x5e4] ss:$16 sps:$4 sm:$0xff]  }
  0x9d   :  { %2084 = vmatmul.mubr.bf16.vlgmr.msra.gmra.mrb[0].mxu1 %v4847_v8 }
  0x9e   :  { %2125 = vmatmul.mubr.bf16.vlgmr.msra.gmra.mrb[0].mxu0 %v4849_v11  ;;  %2257 = vmatpush1.bf16.msra.mxu1 %v4022_v10  ;;  %v4109_v10 = vld [vmem:[#allocation5 + $0x5e0] ss:$16 sps:$4 sm:$0xff]  }
  0x9f   :  { %2134 = vmatpush1.bf16.msra.mxu0 %v4019_v9  ;;  %2258 = vmatprep.subr.bf16.mxu1 %v4030_v13  ;;  %v4114_v9 = vld [vmem:[#allocation5 + $0x1ec] ss:$16 sps:$4 sm:$0xff]   ;;  %v93_v13 = vld [vmem:[#allocation2 + $0x20] sm:$0xff] }
  0xa0   :  { %2135 = vmatprep.subr.bf16.mxu0 %v4027_v12  ;;  %2288 = vmatprep.mubr.bf16.mxu1 %v4841_v48  ;;  %v4073_v48 = vld [vmem:[#allocation5 + $0x520] ss:$16 sps:$4 sm:$0xff]   ;;  %v4112_v12 = vld [vmem:[#allocation5 + $0x1e8] ss:$16 sps:$4 sm:$0xff]  }
  0xa1   :  { %2165 = vmatprep.mubr.bf16.mxu0 %v4854_v36 }
  0xa2   :  { %2259 = vmatpush1.bf16.msra.mxu1 %v4028_v15  ;;  %v4120_v15 = vld [vmem:[#allocation5 + $0x20c] ss:$16 sps:$4 sm:$0xff]  }
  0xa3   :  { %2136 = vmatpush1.bf16.msra.mxu0 %v4025_v14  ;;  %2260 = vmatprep.subr.bf16.mxu1 %v4036_v17  ;;  %v4117_v14 = vld [vmem:[#allocation5 + $0x604] ss:$16 sps:$4 sm:$0xff]   ;;  %v4115_v17 = vld [vmem:[#allocation5 + $0x600] ss:$16 sps:$4 sm:$0xff]  }
  0xa4   :  { %2137 = vmatprep.subr.bf16.mxu0 %v4033_v16  ;;  %v4857_v16 = vpack.c.bf16 %v93_v13, %v93_v13  ;;  %v4199_v13 = vld [vmem:[#allocation5 + $0x7c0] ss:$16 sps:$4 sm:$0xff]  }
  0xa6   :  { %2261 = vmatpush1.bf16.msra.mxu1 %v4034_v19  ;;  %v4123_v19 = vld [vmem:[#allocation5 + $0x624] ss:$16 sps:$4 sm:$0xff]  }
  0xa7   :  { %2138 = vmatpush1.bf16.msra.mxu0 %v4031_v18  ;;  %2262 = vmatprep.subr.bf16.mxu1 %v4042_v21  ;;  %v4118_v18 = vld [vmem:[#allocation5 + $0x208] ss:$16 sps:$4 sm:$0xff]  }
  0xa8   :  { %2139 = vmatprep.subr.bf16.mxu0 %v4039_v20  ;;  %v4126_v20 = vld [vmem:[#allocation5 + $0x22c] ss:$16 sps:$4 sm:$0xff]  }
  0xa9   :  { %v96_v21 = vld [vmem:[#allocation2 + $0x38] sm:$0xff] }
  0xaa   :  { %2263 = vmatpush1.bf16.msra.mxu1 %v4040_v23  ;;  %v4861_v23 = vpack.c.bf16 %v96_v21, %v96_v21  ;;  %v95_v21 = vld [vmem:[#allocation2 + $0x30] sm:$0xff] }
  0xab   :  { %2140 = vmatpush1.bf16.msra.mxu0 %v4037_v22  ;;  %2264 = vmatprep.subr.bf16.mxu1 %v4048_v25  ;;  %v4121_v22 = vld [vmem:[#allocation5 + $0x620] ss:$16 sps:$4 sm:$0xff]   ;;  %v4129_v25 = vld [vmem:[#allocation5 + $0x644] ss:$16 sps:$4 sm:$0xff]  }
  0xac   :  { %2141 = vmatprep.subr.bf16.mxu0 %v4045_v24  ;;  %v4124_v24 = vld [vmem:[#allocation5 + $0x228] ss:$16 sps:$4 sm:$0xff]  }
  0xae   :  { %2265 = vmatpush1.bf16.msra.mxu1 %v4046_v27  ;;  %v4127_v27 = vld [vmem:[#allocation5 + $0x640] ss:$16 sps:$4 sm:$0xff]  }
  0xaf   :  { %2142 = vmatpush1.bf16.msra.mxu0 %v4043_v26  ;;  %2266 = vmatprep.subr.bf16.mxu1 %v4054_v29  ;;  %v4132_v26 = vld [vmem:[#allocation5 + $0x24c] ss:$16 sps:$4 sm:$0xff]   ;;  %v4135_v29 = vld [vmem:[#allocation5 + $0x664] ss:$16 sps:$4 sm:$0xff]  }
  0xb0   :  { %2143 = vmatprep.subr.bf16.mxu0 %v4051_v28  ;;  %v4130_v28 = vld [vmem:[#allocation5 + $0x248] ss:$16 sps:$4 sm:$0xff]  }
  0xb2   :  { %2267 = vmatpush1.bf16.msra.mxu1 %v4052_v31  ;;  %v4136_v31 = vld [vmem:[#allocation5 + $0x268] ss:$16 sps:$4 sm:$0xff]  }
  0xb3   :  { %2144 = vmatpush1.bf16.msra.mxu0 %v4049_v30  ;;  %2268 = vmatprep.subr.bf16.mxu1 %v4060_v33  ;;  %v4133_v30 = vld [vmem:[#allocation5 + $0x660] ss:$16 sps:$4 sm:$0xff]   ;;  %v4144_v33 = vld [vmem:[#allocation5 + $0x28c] ss:$16 sps:$4 sm:$0xff]  }
  0xb4   :  { %2145 = vmatprep.subr.bf16.mxu0 %v4057_v32  ;;  %v4141_v32 = vld [vmem:[#allocation5 + $0x684] ss:$16 sps:$4 sm:$0xff]  }
  0xb6   :  { %2269 = vmatpush1.bf16.msra.mxu1 %v4058_v37  ;;  %v4150_v37 = vld [vmem:[#allocation5 + $0x2ac] ss:$16 sps:$4 sm:$0xff]  }
  0xb7   :  { %2146 = vmatpush1.bf16.msra.mxu0 %v4055_v35  ;;  %2270 = vmatprep.subr.bf16.mxu1 %v4066_v39  ;;  %v4142_v35 = vld [vmem:[#allocation5 + $0x288] ss:$16 sps:$4 sm:$0xff]  }
  0xb8   :  { %2147 = vmatprep.subr.bf16.mxu0 %v4063_v38  ;;  %v4145_v38 = vld [vmem:[#allocation5 + $0x6a0] ss:$16 sps:$4 sm:$0xff]   ;;  %v4148_v39 = vld [vmem:[#allocation5 + $0x2a8] ss:$16 sps:$4 sm:$0xff]  }
  0xba   :  { %2271 = vmatpush1.bf16.msra.mxu1 %v4064_v41  ;;  %v4156_v41 = vld [vmem:[#allocation5 + $0x2cc] ss:$16 sps:$4 sm:$0xff]  }
  0xbb   :  { %2148 = vmatpush1.bf16.msra.mxu0 %v4061_v40  ;;  %2272 = vmatprep.subr.bf16.mxu1 %v4072_v43  ;;  %v4153_v40 = vld [vmem:[#allocation5 + $0x6c4] ss:$16 sps:$4 sm:$0xff]   ;;  %v4154_v43 = vld [vmem:[#allocation5 + $0x2c8] ss:$16 sps:$4 sm:$0xff]  }
  0xbc   :  { %2149 = vmatprep.subr.bf16.mxu0 %v4069_v42  ;;  %v4151_v42 = vld [vmem:[#allocation5 + $0x6c0] ss:$16 sps:$4 sm:$0xff]  }
  0xbe   :  { %2273 = vmatpush1.bf16.msra.mxu1 %v4070_v45  ;;  %v4162_v45 = vld [vmem:[#allocation5 + $0x2ec] ss:$16 sps:$4 sm:$0xff]  }
  0xbf   :  { %2150 = vmatpush1.bf16.msra.mxu0 %v4067_v44  ;;  %2274 = vmatprep.subr.bf16.mxu1 %v4078_v47  ;;  %v4159_v44 = vld [vmem:[#allocation5 + $0x6e4] ss:$16 sps:$4 sm:$0xff]   ;;  %v4160_v47 = vld [vmem:[#allocation5 + $0x2e8] ss:$16 sps:$4 sm:$0xff]  }
  0xc0   :  { %2151 = vmatprep.subr.bf16.mxu0 %v4075_v46  ;;  %v4157_v46 = vld [vmem:[#allocation5 + $0x6e0] ss:$16 sps:$4 sm:$0xff]  }
  0xc2   :  { %2275 = vmatpush1.bf16.msra.mxu1 %v4076_v49  ;;  %v4168_v49 = vld [vmem:[#allocation5 + $0x30c] ss:$16 sps:$4 sm:$0xff]  }
  0xc3   :  { %2152 = vmatpush1.bf16.msra.mxu0 %v4073_v48  ;;  %2276 = vmatprep.subr.bf16.mxu1 %v4084_v51  ;;  %v4165_v48 = vld [vmem:[#allocation5 + $0x704] ss:$16 sps:$4 sm:$0xff]   ;;  %v4166_v51 = vld [vmem:[#allocation5 + $0x308] ss:$16 sps:$4 sm:$0xff]  }
  0xc4   :  { %2153 = vmatprep.subr.bf16.mxu0 %v4081_v50  ;;  %v4163_v50 = vld [vmem:[#allocation5 + $0x700] ss:$16 sps:$4 sm:$0xff]  }
  0xc6   :  { %2277 = vmatpush1.bf16.msra.mxu1 %v4082_v54  ;;  %v4174_v54 = vld [vmem:[#allocation5 + $0x32c] ss:$16 sps:$4 sm:$0xff]  }
  0xc7   :  { %2154 = vmatpush1.bf16.msra.mxu0 %v4079_v53  ;;  %2278 = vmatprep.subr.bf16.mxu1 %v4090_v56  ;;  %v4171_v53 = vld [vmem:[#allocation5 + $0x724] ss:$16 sps:$4 sm:$0xff]   ;;  %v4172_v56 = vld [vmem:[#allocation5 + $0x328] ss:$16 sps:$4 sm:$0xff]  }
  0xc8   :  { %2155 = vmatprep.subr.bf16.mxu0 %v4087_v55  ;;  %v4169_v55 = vld [vmem:[#allocation5 + $0x720] ss:$16 sps:$4 sm:$0xff]  }
  0xca   :  { %2279 = vmatpush1.bf16.msra.mxu1 %v4088_v58  ;;  %v4180_v58 = vld [vmem:[#allocation5 + $0x34c] ss:$16 sps:$4 sm:$0xff]  }
  0xcb   :  { %2156 = vmatpush1.bf16.msra.mxu0 %v4085_v57  ;;  %2280 = vmatprep.subr.bf16.mxu1 %v4096_v60  ;;  %v4177_v57 = vld [vmem:[#allocation5 + $0x744] ss:$16 sps:$4 sm:$0xff]   ;;  %v4178_v60 = vld [vmem:[#allocation5 + $0x348] ss:$16 sps:$4 sm:$0xff]  }
  0xcc   :  { %2157 = vmatprep.subr.bf16.mxu0 %v4093_v59  ;;  %v4175_v59 = vld [vmem:[#allocation5 + $0x740] ss:$16 sps:$4 sm:$0xff]  }
  0xce   :  { %2281 = vmatpush1.bf16.msra.mxu1 %v4094_v62  ;;  %v4186_v62 = vld [vmem:[#allocation5 + $0x36c] ss:$16 sps:$4 sm:$0xff]  }
  0xcf   :  { %2158 = vmatpush1.bf16.msra.mxu0 %v4091_v61  ;;  %2282 = vmatprep.subr.bf16.mxu1 %v4102_v0  ;;  %v4183_v61 = vld [vmem:[#allocation5 + $0x764] ss:$16 sps:$4 sm:$0xff]   ;;  %v4184_v0 = vld [vmem:[#allocation5 + $0x368] ss:$16 sps:$4 sm:$0xff]  }
  0xd0   :  { %2159 = vmatprep.subr.bf16.mxu0 %v4099_v63  ;;  %v4181_v63 = vld [vmem:[#allocation5 + $0x760] ss:$16 sps:$4 sm:$0xff]  }
  0xd2   :  { %2283 = vmatpush1.bf16.msra.mxu1 %v4100_v2  ;;  %v4192_v2 = vld [vmem:[#allocation5 + $0x38c] ss:$16 sps:$4 sm:$0xff]  }
  0xd3   :  { %2160 = vmatpush1.bf16.msra.mxu0 %v4097_v1  ;;  %2284 = vmatprep.subr.bf16.mxu1 %v4108_v4  ;;  %v4189_v1 = vld [vmem:[#allocation5 + $0x784] ss:$16 sps:$4 sm:$0xff]   ;;  %v4190_v4 = vld [vmem:[#allocation5 + $0x388] ss:$16 sps:$4 sm:$0xff]  }
  0xd4   :  { %2161 = vmatprep.subr.bf16.mxu0 %v4105_v3  ;;  %v4187_v3 = vld [vmem:[#allocation5 + $0x780] ss:$16 sps:$4 sm:$0xff]  }
  0xd6   :  { %2285 = vmatpush1.bf16.msra.mxu1 %v4106_v6  ;;  %v4198_v6 = vld [vmem:[#allocation5 + $0x3ac] ss:$16 sps:$4 sm:$0xff]  }
  0xd7   :  { %2162 = vmatpush1.bf16.msra.mxu0 %v4103_v5  ;;  %2286 = vmatprep.subr.bf16.mxu1 %v4114_v9  ;;  %v4195_v5 = vld [vmem:[#allocation5 + $0x7a4] ss:$16 sps:$4 sm:$0xff]   ;;  %v4196_v9 = vld [vmem:[#allocation5 + $0x3a8] ss:$16 sps:$4 sm:$0xff]  }
  0xd8   :  { %2163 = vmatprep.subr.bf16.mxu0 %v4111_v7  ;;  %v4193_v7 = vld [vmem:[#allocation5 + $0x7a0] ss:$16 sps:$4 sm:$0xff]  }
  0xda   :  { %2287 = vmatpush1.bf16.msra.mxu1 %v4112_v12  ;;  %v4204_v12 = vld [vmem:[#allocation5 + $0x3cc] ss:$16 sps:$4 sm:$0xff]  }
  0xdb   :  { %2164 = vmatpush1.bf16.msra.mxu0 %v4109_v10  ;;  %2297 = vmatprep.subr.bf16.mxu1 %v4120_v15  ;;  %v4201_v10 = vld [vmem:[#allocation5 + $0x7c4] ss:$16 sps:$4 sm:$0xff]  }
  0xdc   :  { %2174 = vmatprep.subr.bf16.mxu0 %v4117_v14  ;;  %v4202_v14 = vld [vmem:[#allocation5 + $0x3c8] ss:$16 sps:$4 sm:$0xff]   ;;  %v4207_v15 = vld [vmem:[#allocation5 + $0x7e4] ss:$16 sps:$4 sm:$0xff]  }
  0xdd   :  { %2289 = vmatmul.mubr.bf16.vlgmr.msra.gmra.mrb[4].mxu1 %v4847_v8  ;;  %v4138_v8 = vld [vmem:[#allocation5 + $0x26c] ss:$16 sps:$4 sm:$0xff]  }
  0xde   :  { %2166 = vmatmul.mubr.bf16.vlgmr.msra.gmra.mrb[0].mxu0 %v4857_v16  ;;  %2298 = vmatpush1.bf16.msra.mxu1 %v4118_v18  ;;  %v4205_v18 = vld [vmem:[#allocation5 + $0x7e0] ss:$16 sps:$4 sm:$0xff]  }
  0xdf   :  { %2175 = vmatpush1.bf16.msra.mxu0 %v4115_v17  ;;  %2299 = vmatprep.subr.bf16.mxu1 %v4126_v20  ;;  %v4210_v17 = vld [vmem:[#allocation5 + $0x3ec] ss:$16 sps:$4 sm:$0xff]   ;;  %v4213_v20 = vld [vmem:[#allocation5 + $0x804] ss:$16 sps:$4 sm:$0xff]  }
  0xe0   :  { %2176 = vmatprep.subr.bf16.mxu0 %v4123_v19  ;;  %2206 = vmatprep.mubr.bf16.mxu0 %v4861_v23  ;;  %v4208_v19 = vld [vmem:[#allocation5 + $0x3e8] ss:$16 sps:$4 sm:$0xff]  }
  0xe1   :  { %2329 = vmatprep.mubr.bf16.mxu1 %v4843_v52  ;;  %v4147_v52 = vld [vmem:[#allocation5 + $0x6a4] ss:$16 sps:$4 sm:$0xff]  }
  0xe2   :  { %2300 = vmatpush1.bf16.msra.mxu1 %v4124_v24  ;;  %v4211_v24 = vld [vmem:[#allocation5 + $0x800] ss:$16 sps:$4 sm:$0xff]  }
  0xe3   :  { %2177 = vmatpush1.bf16.msra.mxu0 %v4121_v22  ;;  %2301 = vmatprep.subr.bf16.mxu1 %v4132_v26  ;;  %v4216_v22 = vld [vmem:[#allocation5 + $0x40c] ss:$16 sps:$4 sm:$0xff]  }
  0xe4   :  { %2178 = vmatprep.subr.bf16.mxu0 %v4129_v25  ;;  %v4865_v25 = vpack.c.bf16 %v95_v21, %v95_v21  ;;  %v98_v26 = vld [vmem:[#allocation2 + $0x48] sm:$0xff] }
  0xe5   :  { %v4298_v21 = vld [vmem:[#allocation5 + $0x5c8] ss:$16 sps:$4 sm:$0xff]  }
  0xe6   :  { %2302 = vmatpush1.bf16.msra.mxu1 %v4130_v28  ;;  %v4219_v28 = vld [vmem:[#allocation5 + $0x824] ss:$16 sps:$4 sm:$0xff]  }
  0xe7   :  { %2179 = vmatpush1.bf16.msra.mxu0 %v4127_v27  ;;  %2303 = vmatprep.subr.bf16.mxu1 %v4138_v8  ;;  %v4214_v27 = vld [vmem:[#allocation5 + $0x408] ss:$16 sps:$4 sm:$0xff]   ;;  %v4867_v8 = vpack.c.bf16 %v98_v26, %v98_v26  ;;  %v4301_v26 = vld [vmem:[#allocation5 + $0x9e0] ss:$16 sps:$4 sm:$0xff]  }
  0xe8   :  { %2180 = vmatprep.subr.bf16.mxu0 %v4135_v29  ;;  %v4222_v29 = vld [vmem:[#allocation5 + $0x42c] ss:$16 sps:$4 sm:$0xff]  }
  0xea   :  { %2304 = vmatpush1.bf16.msra.mxu1 %v4136_v31  ;;  %v4220_v31 = vld [vmem:[#allocation5 + $0x428] ss:$16 sps:$4 sm:$0xff]  }
  0xeb   :  { %2181 = vmatpush1.bf16.msra.mxu0 %v4133_v30  ;;  %2305 = vmatprep.subr.bf16.mxu1 %v4144_v33  ;;  %v4217_v30 = vld [vmem:[#allocation5 + $0x820] ss:$16 sps:$4 sm:$0xff]   ;;  %v4228_v33 = vld [vmem:[#allocation5 + $0x44c] ss:$16 sps:$4 sm:$0xff]  }
  0xec   :  { %2182 = vmatprep.subr.bf16.mxu0 %v4141_v32  ;;  %v4225_v32 = vld [vmem:[#allocation5 + $0x844] ss:$16 sps:$4 sm:$0xff]  }
  0xee   :  { %2306 = vmatpush1.bf16.msra.mxu1 %v4142_v35  ;;  %v4226_v35 = vld [vmem:[#allocation5 + $0x448] ss:$16 sps:$4 sm:$0xff]  }
  0xef   :  { %2183 = vmatpush1.bf16.msra.mxu0 %v4139_v34  ;;  %2307 = vmatprep.subr.bf16.mxu1 %v4150_v37  ;;  %v4223_v34 = vld [vmem:[#allocation5 + $0x840] ss:$16 sps:$4 sm:$0xff]   ;;  %v4234_v37 = vld [vmem:[#allocation5 + $0x46c] ss:$16 sps:$4 sm:$0xff]  }
  0xf0   :  { %2184 = vmatprep.subr.bf16.mxu0 %v4147_v52  ;;  %v4231_v52 = vld [vmem:[#allocation5 + $0x864] ss:$16 sps:$4 sm:$0xff]  }
  0xf2   :  { %2308 = vmatpush1.bf16.msra.mxu1 %v4148_v39  ;;  %v4237_v39 = vld [vmem:[#allocation5 + $0x884] ss:$16 sps:$4 sm:$0xff]  }
  0xf3   :  { %2185 = vmatpush1.bf16.msra.mxu0 %v4145_v38  ;;  %2309 = vmatprep.subr.bf16.mxu1 %v4156_v41  ;;  %v4232_v38 = vld [vmem:[#allocation5 + $0x468] ss:$16 sps:$4 sm:$0xff]   ;;  %v4235_v41 = vld [vmem:[#allocation5 + $0x880] ss:$16 sps:$4 sm:$0xff]  }
  0xf4   :  { %2186 = vmatprep.subr.bf16.mxu0 %v4153_v40  ;;  %v4240_v40 = vld [vmem:[#allocation5 + $0x48c] ss:$16 sps:$4 sm:$0xff]  }
  0xf6   :  { %2310 = vmatpush1.bf16.msra.mxu1 %v4154_v43  ;;  %v4243_v43 = vld [vmem:[#allocation5 + $0x8a4] ss:$16 sps:$4 sm:$0xff]  }
  0xf7   :  { %2187 = vmatpush1.bf16.msra.mxu0 %v4151_v42  ;;  %2311 = vmatprep.subr.bf16.mxu1 %v4162_v45  ;;  %v4238_v42 = vld [vmem:[#allocation5 + $0x488] ss:$16 sps:$4 sm:$0xff]  }
  0xf8   :  { %2188 = vmatprep.subr.bf16.mxu0 %v4159_v44  ;;  %v4241_v44 = vld [vmem:[#allocation5 + $0x8a0] ss:$16 sps:$4 sm:$0xff]   ;;  %v4244_v45 = vld [vmem:[#allocation5 + $0x4a8] ss:$16 sps:$4 sm:$0xff]  }
  0xfa   :  { %2312 = vmatpush1.bf16.msra.mxu1 %v4160_v47  ;;  %v4252_v47 = vld [vmem:[#allocation5 + $0x4cc] ss:$16 sps:$4 sm:$0xff]  }
  0xfb   :  { %2189 = vmatpush1.bf16.msra.mxu0 %v4157_v46  ;;  %2313 = vmatprep.subr.bf16.mxu1 %v4168_v49  ;;  %v4249_v46 = vld [vmem:[#allocation5 + $0x8c4] ss:$16 sps:$4 sm:$0xff]   ;;  %v4250_v49 = vld [vmem:[#allocation5 + $0x4c8] ss:$16 sps:$4 sm:$0xff]  }
  0xfc   :  { %2190 = vmatprep.subr.bf16.mxu0 %v4165_v48  ;;  %v4247_v48 = vld [vmem:[#allocation5 + $0x8c0] ss:$16 sps:$4 sm:$0xff]  }
  0xfe   :  { %2314 = vmatpush1.bf16.msra.mxu1 %v4166_v51  ;;  %v4258_v51 = vld [vmem:[#allocation5 + $0x4ec] ss:$16 sps:$4 sm:$0xff]  }
  0xff   :  { %2191 = vmatpush1.bf16.msra.mxu0 %v4163_v50  ;;  %2315 = vmatprep.subr.bf16.mxu1 %v4174_v54  ;;  %v4255_v50 = vld [vmem:[#allocation5 + $0x8e4] ss:$16 sps:$4 sm:$0xff]   ;;  %v4256_v54 = vld [vmem:[#allocation5 + $0x4e8] ss:$16 sps:$4 sm:$0xff]  }
 0x100   :  { %2192 = vmatprep.subr.bf16.mxu0 %v4171_v53  ;;  %v4253_v53 = vld [vmem:[#allocation5 + $0x8e0] ss:$16 sps:$4 sm:$0xff]  }
 0x102   :  { %2316 = vmatpush1.bf16.msra.mxu1 %v4172_v56  ;;  %v4264_v56 = vld [vmem:[#allocation5 + $0x50c] ss:$16 sps:$4 sm:$0xff]  }
 0x103   :  { %2193 = vmatpush1.bf16.msra.mxu0 %v4169_v55  ;;  %2317 = vmatprep.subr.bf16.mxu1 %v4180_v58  ;;  %v4261_v55 = vld [vmem:[#allocation5 + $0x904] ss:$16 sps:$4 sm:$0xff]   ;;  %v4262_v58 = vld [vmem:[#allocation5 + $0x508] ss:$16 sps:$4 sm:$0xff]  }
 0x104   :  { %2194 = vmatprep.subr.bf16.mxu0 %v4177_v57  ;;  %v4259_v57 = vld [vmem:[#allocation5 + $0x900] ss:$16 sps:$4 sm:$0xff]  }
 0x106   :  { %2318 = vmatpush1.bf16.msra.mxu1 %v4178_v60  ;;  %v4270_v60 = vld [vmem:[#allocation5 + $0x52c] ss:$16 sps:$4 sm:$0xff]  }
 0x107   :  { %2195 = vmatpush1.bf16.msra.mxu0 %v4175_v59  ;;  %2319 = vmatprep.subr.bf16.mxu1 %v4186_v62  ;;  %v4267_v59 = vld [vmem:[#allocation5 + $0x924] ss:$16 sps:$4 sm:$0xff]   ;;  %v4268_v62 = vld [vmem:[#allocation5 + $0x528] ss:$16 sps:$4 sm:$0xff]  }
 0x108   :  { %2196 = vmatprep.subr.bf16.mxu0 %v4183_v61  ;;  %v4265_v61 = vld [vmem:[#allocation5 + $0x920] ss:$16 sps:$4 sm:$0xff]  }
 0x10a   :  { %2320 = vmatpush1.bf16.msra.mxu1 %v4184_v0  ;;  %v4276_v0 = vld [vmem:[#allocation5 + $0x54c] ss:$16 sps:$4 sm:$0xff]  }
 0x10b   :  { %2197 = vmatpush1.bf16.msra.mxu0 %v4181_v63  ;;  %2321 = vmatprep.subr.bf16.mxu1 %v4192_v2  ;;  %v4273_v63 = vld [vmem:[#allocation5 + $0x944] ss:$16 sps:$4 sm:$0xff]   ;;  %v4274_v2 = vld [vmem:[#allocation5 + $0x548] ss:$16 sps:$4 sm:$0xff]  }
 0x10c   :  { %2198 = vmatprep.subr.bf16.mxu0 %v4189_v1  ;;  %v4271_v1 = vld [vmem:[#allocation5 + $0x940] ss:$16 sps:$4 sm:$0xff]  }
 0x10e   :  { %2322 = vmatpush1.bf16.msra.mxu1 %v4190_v4  ;;  %v4282_v4 = vld [vmem:[#allocation5 + $0x56c] ss:$16 sps:$4 sm:$0xff]  }
 0x10f   :  { %2199 = vmatpush1.bf16.msra.mxu0 %v4187_v3  ;;  %2323 = vmatprep.subr.bf16.mxu1 %v4198_v6  ;;  %v4279_v3 = vld [vmem:[#allocation5 + $0x964] ss:$16 sps:$4 sm:$0xff]   ;;  %v4280_v6 = vld [vmem:[#allocation5 + $0x568] ss:$16 sps:$4 sm:$0xff]  }
 0x110   :  { %2200 = vmatprep.subr.bf16.mxu0 %v4195_v5  ;;  %v4277_v5 = vld [vmem:[#allocation5 + $0x960] ss:$16 sps:$4 sm:$0xff]  }
 0x112   :  { %2324 = vmatpush1.bf16.msra.mxu1 %v4196_v9  ;;  %v4288_v9 = vld [vmem:[#allocation5 + $0x58c] ss:$16 sps:$4 sm:$0xff]  }
 0x113   :  { %2201 = vmatpush1.bf16.msra.mxu0 %v4193_v7  ;;  %2325 = vmatprep.subr.bf16.mxu1 %v4204_v12  ;;  %v4285_v7 = vld [vmem:[#allocation5 + $0x984] ss:$16 sps:$4 sm:$0xff]   ;;  %v4286_v12 = vld [vmem:[#allocation5 + $0x588] ss:$16 sps:$4 sm:$0xff]  }
 0x114   :  { %2202 = vmatprep.subr.bf16.mxu0 %v4201_v10  ;;  %v4283_v10 = vld [vmem:[#allocation5 + $0x980] ss:$16 sps:$4 sm:$0xff]  }
 0x116   :  { %2326 = vmatpush1.bf16.msra.mxu1 %v4202_v14  ;;  %v4294_v14 = vld [vmem:[#allocation5 + $0x5ac] ss:$16 sps:$4 sm:$0xff]  }
 0x117   :  { %2203 = vmatpush1.bf16.msra.mxu0 %v4199_v13  ;;  %2327 = vmatprep.subr.bf16.mxu1 %v4210_v17  ;;  %v4291_v13 = vld [vmem:[#allocation5 + $0x9a4] ss:$16 sps:$4 sm:$0xff]   ;;  %v4292_v17 = vld [vmem:[#allocation5 + $0x5a8] ss:$16 sps:$4 sm:$0xff]  }
 0x118   :  { %2204 = vmatprep.subr.bf16.mxu0 %v4207_v15  ;;  %v4289_v15 = vld [vmem:[#allocation5 + $0x9a0] ss:$16 sps:$4 sm:$0xff]  }
 0x11a   :  { %2328 = vmatpush1.bf16.msra.mxu1 %v4208_v19  ;;  %v4300_v19 = vld [vmem:[#allocation5 + $0x5cc] ss:$16 sps:$4 sm:$0xff]  }
 0x11b   :  { %2205 = vmatpush1.bf16.msra.mxu0 %v4205_v18  ;;  %2338 = vmatprep.subr.bf16.mxu1 %v4216_v22  ;;  %v4297_v18 = vld [vmem:[#allocation5 + $0x9c4] ss:$16 sps:$4 sm:$0xff]  }
 0x11c   :  { %2215 = vmatprep.subr.bf16.mxu0 %v4213_v20  ;;  %v4295_v20 = vld [vmem:[#allocation5 + $0x9c0] ss:$16 sps:$4 sm:$0xff]   ;;  %v4303_v22 = vld [vmem:[#allocation5 + $0x9e4] ss:$16 sps:$4 sm:$0xff]  }
 0x11d   :  { %2330 = vmatmul.mubr.bf16.vlgmr.msra.gmra.mrb[4].mxu1 %v4849_v11  ;;  %v4229_v11 = vld [vmem:[#allocation5 + $0x860] ss:$16 sps:$4 sm:$0xff]  }
 0x11e   :  { %2207 = vmatmul.mubr.bf16.vlgmr.msra.gmra.mrb[0].mxu0 %v4865_v25  ;;  %2339 = vmatpush1.bf16.msra.mxu1 %v4214_v27  ;;  %v4304_v27 = vld [vmem:[#allocation5 + $0x5e8] ss:$16 sps:$4 sm:$0xff]  }
 0x11f   :  { %2216 = vmatpush1.bf16.msra.mxu0 %v4211_v24  ;;  %2340 = vmatprep.subr.bf16.mxu1 %v4222_v29  ;;  %v4306_v24 = vld [vmem:[#allocation5 + $0x5ec] ss:$16 sps:$4 sm:$0xff]  }
 0x120   :  { %2217 = vmatprep.subr.bf16.mxu0 %v4219_v28  ;;  %2247 = vmatprep.mubr.bf16.mxu0 %v4867_v8  ;;  %v97_v28 = vld [vmem:[#allocation2 + $0x40] sm:$0xff]  ;;  %v4309_v29 = vld [vmem:[#allocation5 + $0x60c] ss:$16 sps:$4 sm:$0xff]  }
 0x121   :  { %2370 = vmatprep.mubr.bf16.mxu1 %v4854_v36  ;;  %v4246_v36 = vld [vmem:[#allocation5 + $0x4ac] ss:$16 sps:$4 sm:$0xff]  }
 0x122   :  { %2341 = vmatpush1.bf16.msra.mxu1 %v4220_v31  ;;  %v4307_v31 = vld [vmem:[#allocation5 + $0x608] ss:$16 sps:$4 sm:$0xff]  }
 0x123   :  { %2218 = vmatpush1.bf16.msra.mxu0 %v4217_v30  ;;  %2342 = vmatprep.subr.bf16.mxu1 %v4228_v33  ;;  %v4873_v30 = vpack.c.bf16 %v97_v28, %v97_v28  ;;  %v4310_v33 = vld [vmem:[#allocation5 + $0x628] ss:$16 sps:$4 sm:$0xff]   ;;  %v4396_v28 = vld [vmem:[#allocation5 + $0x9ac] ss:$16 sps:$4 sm:$0xff]  }
 0x124   :  { %2219 = vmatprep.subr.bf16.mxu0 %v4225_v32  ;;  %v4312_v32 = vld [vmem:[#allocation5 + $0x62c] ss:$16 sps:$4 sm:$0xff]  }
 0x126   :  { %2343 = vmatpush1.bf16.msra.mxu1 %v4226_v35  ;;  %v4313_v35 = vld [vmem:[#allocation5 + $0x648] ss:$16 sps:$4 sm:$0xff]  }
 0x127   :  { %2220 = vmatpush1.bf16.msra.mxu0 %v4223_v34  ;;  %2344 = vmatprep.subr.bf16.mxu1 %v4234_v37  ;;  %v4315_v34 = vld [vmem:[#allocation5 + $0x64c] ss:$16 sps:$4 sm:$0xff]   ;;  %v4316_v37 = vld [vmem:[#allocation5 + $0x668] ss:$16 sps:$4 sm:$0xff]  }
 0x128   :  { %2221 = vmatprep.subr.bf16.mxu0 %v4231_v52  ;;  %v4318_v52 = vld [vmem:[#allocation5 + $0x66c] ss:$16 sps:$4 sm:$0xff]  }
 0x12a   :  { %2345 = vmatpush1.bf16.msra.mxu1 %v4232_v38  ;;  %v4319_v38 = vld [vmem:[#allocation5 + $0x688] ss:$16 sps:$4 sm:$0xff]  }
 0x12b   :  { %2222 = vmatpush1.bf16.msra.mxu0 %v4229_v11  ;;  %2346 = vmatprep.subr.bf16.mxu1 %v4240_v40  ;;  %v4321_v11 = vld [vmem:[#allocation5 + $0x68c] ss:$16 sps:$4 sm:$0xff]  }
 0x12c   :  { %2223 = vmatprep.subr.bf16.mxu0 %v4237_v39  ;;  %v4324_v39 = vld [vmem:[#allocation5 + $0x6ac] ss:$16 sps:$4 sm:$0xff]  }
 0x12d   :  { %v4327_v40 = vld [vmem:[#allocation5 + $0x6cc] ss:$16 sps:$4 sm:$0xff]  }
 0x12e   :  { %2347 = vmatpush1.bf16.msra.mxu1 %v4238_v42 }
 0x12f   :  { %2224 = vmatpush1.bf16.msra.mxu0 %v4235_v41  ;;  %2348 = vmatprep.subr.bf16.mxu1 %v4246_v36 }
 0x130   :  { %2225 = vmatprep.subr.bf16.mxu0 %v4243_v43  ;;  %v4325_v43 = vld [vmem:[#allocation5 + $0x6c8] ss:$16 sps:$4 sm:$0xff]  }
 0x132   :  { %2349 = vmatpush1.bf16.msra.mxu1 %v4244_v45  ;;  %v4328_v45 = vld [vmem:[#allocation5 + $0x6e8] ss:$16 sps:$4 sm:$0xff]  }
 0x133   :  { %2226 = vmatpush1.bf16.msra.mxu0 %v4241_v44  ;;  %2350 = vmatprep.subr.bf16.mxu1 %v4252_v47  ;;  %v4330_v44 = vld [vmem:[#allocation5 + $0x6ec] ss:$16 sps:$4 sm:$0xff]   ;;  %v4331_v47 = vld [vmem:[#allocation5 + $0x708] ss:$16 sps:$4 sm:$0xff]  }
 0x134   :  { %2227 = vmatprep.subr.bf16.mxu0 %v4249_v46  ;;  %v4333_v46 = vld [vmem:[#allocation5 + $0x70c] ss:$16 sps:$4 sm:$0xff]  }
 0x136   :  { %2351 = vmatpush1.bf16.msra.mxu1 %v4250_v49  ;;  %v4334_v49 = vld [vmem:[#allocation5 + $0x728] ss:$16 sps:$4 sm:$0xff]  }
 0x137   :  { %2228 = vmatpush1.bf16.msra.mxu0 %v4247_v48  ;;  %2352 = vmatprep.subr.bf16.mxu1 %v4258_v51  ;;  %v4336_v48 = vld [vmem:[#allocation5 + $0x72c] ss:$16 sps:$4 sm:$0xff]   ;;  %v4337_v51 = vld [vmem:[#allocation5 + $0x748] ss:$16 sps:$4 sm:$0xff]  }
 0x138   :  { %2229 = vmatprep.subr.bf16.mxu0 %v4255_v50  ;;  %v4339_v50 = vld [vmem:[#allocation5 + $0x74c] ss:$16 sps:$4 sm:$0xff]  }
 0x13a   :  { %2353 = vmatpush1.bf16.msra.mxu1 %v4256_v54  ;;  %v4340_v54 = vld [vmem:[#allocation5 + $0x768] ss:$16 sps:$4 sm:$0xff]  }
 0x13b   :  { %2230 = vmatpush1.bf16.msra.mxu0 %v4253_v53  ;;  %2354 = vmatprep.subr.bf16.mxu1 %v4264_v56  ;;  %v4342_v53 = vld [vmem:[#allocation5 + $0x76c] ss:$16 sps:$4 sm:$0xff]   ;;  %v4343_v56 = vld [vmem:[#allocation5 + $0x788] ss:$16 sps:$4 sm:$0xff]  }
 0x13c   :  { %2231 = vmatprep.subr.bf16.mxu0 %v4261_v55  ;;  %v4345_v55 = vld [vmem:[#allocation5 + $0x78c] ss:$16 sps:$4 sm:$0xff]  }
 0x13e   :  { %2355 = vmatpush1.bf16.msra.mxu1 %v4262_v58  ;;  %v4346_v58 = vld [vmem:[#allocation5 + $0x7a8] ss:$16 sps:$4 sm:$0xff]  }
 0x13f   :  { %2232 = vmatpush1.bf16.msra.mxu0 %v4259_v57  ;;  %2356 = vmatprep.subr.bf16.mxu1 %v4270_v60  ;;  %v4348_v57 = vld [vmem:[#allocation5 + $0x7ac] ss:$16 sps:$4 sm:$0xff]   ;;  %v4349_v60 = vld [vmem:[#allocation5 + $0x7c8] ss:$16 sps:$4 sm:$0xff]  }
 0x140   :  { %2233 = vmatprep.subr.bf16.mxu0 %v4267_v59  ;;  %v4351_v59 = vld [vmem:[#allocation5 + $0x7cc] ss:$16 sps:$4 sm:$0xff]  }
 0x142   :  { %2357 = vmatpush1.bf16.msra.mxu1 %v4268_v62  ;;  %v4352_v62 = vld [vmem:[#allocation5 + $0x7e8] ss:$16 sps:$4 sm:$0xff]  }
 0x143   :  { %2234 = vmatpush1.bf16.msra.mxu0 %v4265_v61  ;;  %2358 = vmatprep.subr.bf16.mxu1 %v4276_v0  ;;  %v4354_v61 = vld [vmem:[#allocation5 + $0x7ec] ss:$16 sps:$4 sm:$0xff]   ;;  %v4355_v0 = vld [vmem:[#allocation5 + $0x808] ss:$16 sps:$4 sm:$0xff]  }
 0x144   :  { %2235 = vmatprep.subr.bf16.mxu0 %v4273_v63  ;;  %v4357_v63 = vld [vmem:[#allocation5 + $0x80c] ss:$16 sps:$4 sm:$0xff]  }
 0x146   :  { %2359 = vmatpush1.bf16.msra.mxu1 %v4274_v2  ;;  %v4358_v2 = vld [vmem:[#allocation5 + $0x828] ss:$16 sps:$4 sm:$0xff]  }
 0x147   :  { %2236 = vmatpush1.bf16.msra.mxu0 %v4271_v1  ;;  %2360 = vmatprep.subr.bf16.mxu1 %v4282_v4  ;;  %v4360_v1 = vld [vmem:[#allocation5 + $0x82c] ss:$16 sps:$4 sm:$0xff]   ;;  %v4361_v4 = vld [vmem:[#allocation5 + $0x848] ss:$16 sps:$4 sm:$0xff]  }
 0x148   :  { %2237 = vmatprep.subr.bf16.mxu0 %v4279_v3  ;;  %v4363_v3 = vld [vmem:[#allocation5 + $0x84c] ss:$16 sps:$4 sm:$0xff]  }
 0x14a   :  { %2361 = vmatpush1.bf16.msra.mxu1 %v4280_v6  ;;  %v4364_v6 = vld [vmem:[#allocation5 + $0x868] ss:$16 sps:$4 sm:$0xff]  }
 0x14b   :  { %2238 = vmatpush1.bf16.msra.mxu0 %v4277_v5  ;;  %2362 = vmatprep.subr.bf16.mxu1 %v4288_v9  ;;  %v4366_v5 = vld [vmem:[#allocation5 + $0x86c] ss:$16 sps:$4 sm:$0xff]   ;;  %v4367_v9 = vld [vmem:[#allocation5 + $0x888] ss:$16 sps:$4 sm:$0xff]  }
 0x14c   :  { %2239 = vmatprep.subr.bf16.mxu0 %v4285_v7  ;;  %v4369_v7 = vld [vmem:[#allocation5 + $0x88c] ss:$16 sps:$4 sm:$0xff]  }
 0x14e   :  { %2363 = vmatpush1.bf16.msra.mxu1 %v4286_v12  ;;  %v4375_v12 = vld [vmem:[#allocation5 + $0x8cc] ss:$16 sps:$4 sm:$0xff]  }
 0x14f   :  { %2240 = vmatpush1.bf16.msra.mxu0 %v4283_v10  ;;  %2364 = vmatprep.subr.bf16.mxu1 %v4294_v14  ;;  %v4372_v10 = vld [vmem:[#allocation5 + $0x8ac] ss:$16 sps:$4 sm:$0xff]   ;;  %v4376_v14 = vld [vmem:[#allocation5 + $0x8e8] ss:$16 sps:$4 sm:$0xff]  }
 0x150   :  { %2241 = vmatprep.subr.bf16.mxu0 %v4291_v13  ;;  %v4378_v13 = vld [vmem:[#allocation5 + $0x8ec] ss:$16 sps:$4 sm:$0xff]  }
 0x152   :  { %2365 = vmatpush1.bf16.msra.mxu1 %v4292_v17  ;;  %v4379_v17 = vld [vmem:[#allocation5 + $0x908] ss:$16 sps:$4 sm:$0xff]  }
 0x153   :  { %2242 = vmatpush1.bf16.msra.mxu0 %v4289_v15  ;;  %2366 = vmatprep.subr.bf16.mxu1 %v4300_v19  ;;  %v4381_v15 = vld [vmem:[#allocation5 + $0x90c] ss:$16 sps:$4 sm:$0xff]   ;;  %v4382_v19 = vld [vmem:[#allocation5 + $0x928] ss:$16 sps:$4 sm:$0xff]  }
 0x154   :  { %2243 = vmatprep.subr.bf16.mxu0 %v4297_v18  ;;  %v4384_v18 = vld [vmem:[#allocation5 + $0x92c] ss:$16 sps:$4 sm:$0xff]  }
 0x156   :  { %2367 = vmatpush1.bf16.msra.mxu1 %v4298_v21  ;;  %v4385_v21 = vld [vmem:[#allocation5 + $0x948] ss:$16 sps:$4 sm:$0xff]  }
 0x157   :  { %2244 = vmatpush1.bf16.msra.mxu0 %v4295_v20  ;;  %2368 = vmatprep.subr.bf16.mxu1 %v4306_v24  ;;  %v4387_v20 = vld [vmem:[#allocation5 + $0x94c] ss:$16 sps:$4 sm:$0xff]   ;;  %v4388_v24 = vld [vmem:[#allocation5 + $0x968] ss:$16 sps:$4 sm:$0xff]  }
 0x158   :  { %2245 = vmatprep.subr.bf16.mxu0 %v4303_v22  ;;  %v4390_v22 = vld [vmem:[#allocation5 + $0x96c] ss:$16 sps:$4 sm:$0xff]  }
 0x15a   :  { %2369 = vmatpush1.bf16.msra.mxu1 %v4304_v27  ;;  %v4391_v27 = vld [vmem:[#allocation5 + $0x988] ss:$16 sps:$4 sm:$0xff]  }
 0x15b   :  { %2246 = vmatpush1.bf16.msra.mxu0 %v4301_v26  ;;  %2379 = vmatprep.subr.bf16.mxu1 %v4309_v29  ;;  %v4393_v26 = vld [vmem:[#allocation5 + $0x98c] ss:$16 sps:$4 sm:$0xff]   ;;  %v4394_v29 = vld [vmem:[#allocation5 + $0x9a8] ss:$16 sps:$4 sm:$0xff]  }
 0x15d   :  { %2371 = vmatmul.mubr.bf16.vlgmr.msra.gmra.mrb[4].mxu1 %v4857_v16  ;;  %v4322_v16 = vld [vmem:[#allocation5 + $0x6a8] ss:$16 sps:$4 sm:$0xff]  }
 0x15e   :  { %2248 = vmatmul.mubr.bf16.vlgmr.msra.gmra.mrb[0].mxu0 %v4873_v30  ;;  %2380 = vmatpush1.bf16.msra.mxu1 %v4307_v31  ;;  %v4399_v31 = vld [vmem:[#allocation5 + $0x9cc] ss:$16 sps:$4 sm:$0xff]  }
 0x15f   :  { %2411 = vmatprep.mubr.bf16.mxu1 %v4861_v23  ;;  %2381 = vmatprep.subr.bf16.mxu1 %v4312_v32  ;;  %v4397_v32 = vld [vmem:[#allocation5 + $0x9c8] ss:$16 sps:$4 sm:$0xff]  }
 0x162   :  { %2382 = vmatpush1.bf16.msra.mxu1 %v4310_v33  ;;  %v4402_v33 = vld [vmem:[#allocation5 + $0x9ec] ss:$16 sps:$4 sm:$0xff]  }
 0x163   :  { %2383 = vmatprep.subr.bf16.mxu1 %v4315_v34  ;;  %v4400_v34 = vld [vmem:[#allocation5 + $0x9e8] ss:$16 sps:$4 sm:$0xff]  }
 0x166   :  { %2384 = vmatpush1.bf16.msra.mxu1 %v4313_v35  ;;  %v431_v35 = vlaneseq }
 0x167   :  { %2385 = vmatprep.subr.bf16.mxu1 %v4318_v52 }
 0x168   :  { %v4885_v52 = vshrl.u32 %v431_v35, 7 }
 0x16a   :  { %2386 = vmatpush1.bf16.msra.mxu1 %v4316_v37  ;;  %v4888_v37 = vsub.s32 0, %v4885_v52 }
 0x16b   :  { %2387 = vmatprep.subr.bf16.mxu1 %v4321_v11  ;;  %v4890_v11 = vld [vmem:[#allocation7] ss:$8 sm:$0xf] }
 0x16e   :  { %2388 = vmatpush1.bf16.msra.mxu1 %v4319_v38  ;;  %v4893_v38 = vsub.s32 1, %v4885_v52 }
 0x16f   :  { %2389 = vmatprep.subr.bf16.mxu1 %v4324_v39  ;;  %v434_v39 = vrot.slane %v4890_v11, %v4888_v37 }
 0x170   :  { %v4878_v41 = vpop.f32.mrb[0].mxu1 }
 0x171   :  { %v4880_v23 = vpop.f32.mrb[1].mxu1 }
 0x172   :  { %v2089_v42 = vpop.f32.mrb[2].mxu1  ;;  %2390 = vmatpush1.bf16.msra.mxu1 %v4322_v16  ;;  %v438_v16 = vrot.slane %v4890_v11, %v4893_v38 }
 0x173   :  { %v2090_v36 = vpop.f32.mrb[3].mxu1  ;;  %2391 = vmatprep.subr.bf16.mxu1 %v4327_v40  ;;  %v2086_v40 = vadd.f32 %v4878_v41, %v434_v39  ;;  %v4429_v39 = vld [vmem:[#allocation8 + $0x84] ss:$8 sps:$4 sm:$0xff]  }
 0x176   :  { %2392 = vmatpush1.bf16.msra.mxu1 %v4325_v43 }
 0x177   :  { %2393 = vmatprep.subr.bf16.mxu1 %v4330_v44  ;;  %v4405_v44 = vld [vmem:[#allocation8 + $0x4] ss:$8 sps:$4 sm:$0xff]  }
 0x178   :  { %3170 = vmatprep.subr.bf16.mxu0 %v4405_v44 }
 0x17a   :  { %2394 = vmatpush1.bf16.msra.mxu1 %v4328_v45 }
 0x17b   :  { %2395 = vmatprep.subr.bf16.mxu1 %v4333_v46 }
 0x17e   :  { %2396 = vmatpush1.bf16.msra.mxu1 %v4331_v47  ;;  %v4403_v47 = vld [vmem:[#allocation8] ss:$8 sps:$4 sm:$0xff]  }
 0x17f   :  { %2397 = vmatprep.subr.bf16.mxu1 %v4336_v48  ;;  %3171 = vmatpush1.bf16.msra.mxu0 %v4403_v47  ;;  %v4432_v47 = vld [vmem:[#allocation8 + $0x94] ss:$8 sps:$4 sm:$0xff]  }
 0x182   :  { %2398 = vmatpush1.bf16.msra.mxu1 %v4334_v49 }
 0x183   :  { %2399 = vmatprep.subr.bf16.mxu1 %v4339_v50 }
 0x186   :  { %2400 = vmatpush1.bf16.msra.mxu1 %v4337_v51 }
 0x187   :  { %2401 = vmatprep.subr.bf16.mxu1 %v4342_v53  ;;  %v4408_v53 = vld [vmem:[#allocation8 + $0x14] ss:$8 sps:$4 sm:$0xff]  }
 0x188   :  { %3172 = vmatprep.subr.bf16.mxu0 %v4408_v53  ;;  %v4436_v53 = vld [vmem:[#allocation8 + $0xb0] ss:$8 sps:$4 sm:$0xff]  }
 0x18a   :  { %2402 = vmatpush1.bf16.msra.mxu1 %v4340_v54 }
 0x18b   :  { %2403 = vmatprep.subr.bf16.mxu1 %v4345_v55  ;;  %v4406_v55 = vld [vmem:[#allocation8 + $0x10] ss:$8 sps:$4 sm:$0xff]  }
 0x18c   :  { %3173 = vmatpush1.bf16.msra.mxu0 %v4406_v55 }
 0x18e   :  { %2404 = vmatpush1.bf16.msra.mxu1 %v4343_v56 }
 0x18f   :  { %2405 = vmatprep.subr.bf16.mxu1 %v4348_v57  ;;  %v4411_v57 = vld [vmem:[#allocation8 + $0x24] ss:$8 sps:$4 sm:$0xff]  }
 0x190   :  { %3174 = vmatprep.subr.bf16.mxu0 %v4411_v57  ;;  %v4444_v57 = vld [vmem:[#allocation8 + $0xd4] ss:$8 sps:$4 sm:$0xff]  }
 0x192   :  { %2406 = vmatpush1.bf16.msra.mxu1 %v4346_v58 }
 0x193   :  { %2407 = vmatprep.subr.bf16.mxu1 %v4351_v59  ;;  %v4409_v59 = vld [vmem:[#allocation8 + $0x20] ss:$8 sps:$4 sm:$0xff]  }
 0x194   :  { %3175 = vmatpush1.bf16.msra.mxu0 %v4409_v59  ;;  %v4447_v59 = vld [vmem:[#allocation8 + $0xe4] ss:$8 sps:$4 sm:$0xff]  }
 0x196   :  { %2408 = vmatpush1.bf16.msra.mxu1 %v4349_v60 }
 0x197   :  { %2409 = vmatprep.subr.bf16.mxu1 %v4354_v61 }
 0x19a   :  { %2410 = vmatpush1.bf16.msra.mxu1 %v4352_v62 }
 0x19b   :  { %2420 = vmatprep.subr.bf16.mxu1 %v4357_v63  ;;  %v4414_v63 = vld [vmem:[#allocation8 + $0x34] ss:$8 sps:$4 sm:$0xff]  }
 0x19c   :  { %3176 = vmatprep.subr.bf16.mxu0 %v4414_v63  ;;  %v4453_v63 = vld [vmem:[#allocation8 + $0x104] ss:$8 sps:$4 sm:$0xff]  }
 0x19d   :  { %2412 = vmatmul.mubr.bf16.vlgmr.msra.gmra.mrb[4].mxu1 %v4865_v25  ;;  %v4370_v25 = vld [vmem:[#allocation5 + $0x8a8] ss:$16 sps:$4 sm:$0xff]  }
 0x19e   :  { %2421 = vmatpush1.bf16.msra.mxu1 %v4355_v0  ;;  %2452 = vmatprep.mubr.bf16.mxu1 %v4867_v8  ;;  %v4373_v8 = vld [vmem:[#allocation5 + $0x8c8] ss:$16 sps:$4 sm:$0xff]  }
 0x19f   :  { %2422 = vmatprep.subr.bf16.mxu1 %v4360_v1  ;;  %v4412_v1 = vld [vmem:[#allocation8 + $0x30] ss:$8 sps:$4 sm:$0xff]  }
 0x1a0   :  { %3177 = vmatpush1.bf16.msra.mxu0 %v4412_v1  ;;  %v4931_v1 = vsub.s32 3, %v4885_v52 }
 0x1a2   :  { %2423 = vmatpush1.bf16.msra.mxu1 %v4358_v2 }
 0x1a3   :  { %2424 = vmatprep.subr.bf16.mxu1 %v4363_v3 }
 0x1a6   :  { %2425 = vmatpush1.bf16.msra.mxu1 %v4361_v4 }
 0x1a7   :  { %2426 = vmatprep.subr.bf16.mxu1 %v4366_v5 }
 0x1aa   :  { %2427 = vmatpush1.bf16.msra.mxu1 %v4364_v6  ;;  %v4417_v6 = vld [vmem:[#allocation8 + $0x44] ss:$8 sps:$4 sm:$0xff]  }
 0x1ab   :  { %2428 = vmatprep.subr.bf16.mxu1 %v4369_v7  ;;  %3178 = vmatprep.subr.bf16.mxu0 %v4417_v6 }
 0x1ae   :  { %2429 = vmatpush1.bf16.msra.mxu1 %v4367_v9 }
 0x1af   :  { %2430 = vmatprep.subr.bf16.mxu1 %v4372_v10  ;;  %v4415_v10 = vld [vmem:[#allocation8 + $0x40] ss:$8 sps:$4 sm:$0xff]  }
 0x1b0   :  { %3179 = vmatpush1.bf16.msra.mxu0 %v4415_v10 }
 0x1b2   :  { %2431 = vmatpush1.bf16.msra.mxu1 %v4370_v25 }
 0x1b3   :  { %2432 = vmatprep.subr.bf16.mxu1 %v4375_v12 }
 0x1b6   :  { %2433 = vmatpush1.bf16.msra.mxu1 %v4373_v8 }
 0x1b7   :  { %2434 = vmatprep.subr.bf16.mxu1 %v4378_v13 }
 0x1ba   :  { %2435 = vmatpush1.bf16.msra.mxu1 %v4376_v14  ;;  %v4420_v14 = vld [vmem:[#allocation8 + $0x54] ss:$8 sps:$4 sm:$0xff]  }
 0x1bb   :  { %2436 = vmatprep.subr.bf16.mxu1 %v4381_v15  ;;  %3180 = vmatprep.subr.bf16.mxu0 %v4420_v14 }
 0x1be   :  { %2437 = vmatpush1.bf16.msra.mxu1 %v4379_v17  ;;  %v4418_v17 = vld [vmem:[#allocation8 + $0x50] ss:$8 sps:$4 sm:$0xff]  }
 0x1bf   :  { %2438 = vmatprep.subr.bf16.mxu1 %v4384_v18  ;;  %3181 = vmatpush1.bf16.msra.mxu0 %v4418_v17 }
 0x1c2   :  { %2439 = vmatpush1.bf16.msra.mxu1 %v4382_v19 }
 0x1c3   :  { %2440 = vmatprep.subr.bf16.mxu1 %v4387_v20 }
 0x1c6   :  { %2441 = vmatpush1.bf16.msra.mxu1 %v4385_v21  ;;  %v4423_v21 = vld [vmem:[#allocation8 + $0x64] ss:$8 sps:$4 sm:$0xff]  }
 0x1c7   :  { %2442 = vmatprep.subr.bf16.mxu1 %v4390_v22  ;;  %3182 = vmatprep.subr.bf16.mxu0 %v4423_v21 }
 0x1ca   :  { %2443 = vmatpush1.bf16.msra.mxu1 %v4388_v24  ;;  %v4421_v24 = vld [vmem:[#allocation8 + $0x60] ss:$8 sps:$4 sm:$0xff]  }
 0x1cb   :  { %2444 = vmatprep.subr.bf16.mxu1 %v4393_v26  ;;  %3183 = vmatpush1.bf16.msra.mxu0 %v4421_v24  ;;  %v4730_v24 = vmov 1966171168  }
 0x1ce   :  { %2445 = vmatpush1.bf16.msra.mxu1 %v4391_v27 }
 0x1cf   :  { %2446 = vmatprep.subr.bf16.mxu1 %v4396_v28 }
 0x1d2   :  { %2447 = vmatpush1.bf16.msra.mxu1 %v4394_v29  ;;  %v4426_v29 = vld [vmem:[#allocation8 + $0x74] ss:$8 sps:$4 sm:$0xff]  }
 0x1d3   :  { %2448 = vmatprep.subr.bf16.mxu1 %v4399_v31  ;;  %3184 = vmatprep.subr.bf16.mxu0 %v4426_v29 }
 0x1d6   :  { %2449 = vmatpush1.bf16.msra.mxu1 %v4397_v32  ;;  %v4424_v32 = vld [vmem:[#allocation8 + $0x70] ss:$8 sps:$4 sm:$0xff]  }
 0x1d7   :  { %2450 = vmatprep.subr.bf16.mxu1 %v4402_v33  ;;  %3185 = vmatpush1.bf16.msra.mxu0 %v4424_v32 }
 0x1d8   :  { %3186 = vmatprep.subr.bf16.mxu0 %v4429_v39 }
 0x1da   :  { %2451 = vmatpush1.bf16.msra.mxu1 %v4400_v34 }
 0x1dd   :  { %2453 = vmatmul.mubr.bf16.vlgmr.msra.gmra.mrb[4].mxu1 %v4873_v30  ;;  %v2088_v30 = vadd.f32 %v4880_v23, %v438_v16 }
 0x231   :  { %v2249_v42 = vpop.f32.mrb[0].mxu0 }
 0x232   :  { %v3869_v43 = vadd.f32 %v2249_v42, %v2086_v40  ;;  %v2251_v36 = vpop.f32.mrb[1].mxu0  ;;  %v4427_v40 = vld [vmem:[#allocation8 + $0x80] ss:$8 sps:$4 sm:$0xff]  }
 0x233   :  { %v3871_v45 = vadd.f32 %v2251_v36, %v2088_v30  ;;  %v2253_v46 = vpop.f32.mrb[2].mxu0  ;;  %3187 = vmatpush1.bf16.msra.mxu0 %v4427_v40 }
 0x234   :  { %v2461_v48 = vrot.slane %v3869_v43, 4  ;;  %v2254_v49 = vpop.f32.mrb[3].mxu0  ;;  %v4430_v46 = vld [vmem:[#allocation8 + $0x90] ss:$8 sps:$4 sm:$0xff]   ;;  %3188 = vmatprep.subr.bf16.mxu0 %v4432_v47 }
 0x235   :  { %v2467_v50 = vrot.slane %v3871_v45, 4  ;;  %v4435_v49 = vld [vmem:[#allocation8 + $0xa4] ss:$8 sps:$4 sm:$0xff]  }
 0x236   :  { %v2462_v51 = vadd.f32 %v3869_v43, %v2461_v48 }
 0x237   :  { %v2468_v54 = vadd.f32 %v3871_v45, %v2467_v50  ;;  %3189 = vmatpush1.bf16.msra.mxu0 %v4430_v46  ;;  %v4433_v50 = vld [vmem:[#allocation8 + $0xa0] ss:$8 sps:$4 sm:$0xff]  }
 0x238   :  { %v2463_v56 = vrot.slane %v2462_v51, 2  ;;  %3190 = vmatprep.subr.bf16.mxu0 %v4435_v49 }
 0x239   :  { %v2469_v41 = vrot.slane %v2468_v54, 2 }
 0x23a   :  { %v2464_v23 = vadd.f32 %v2463_v56, %v2462_v51  ;;  %v4438_v51 = vld [vmem:[#allocation8 + $0xb4] ss:$8 sps:$4 sm:$0xff]  }
 0x23b   :  { %v2470_v58 = vadd.f32 %v2469_v41, %v2468_v54  ;;  %3191 = vmatpush1.bf16.msra.mxu0 %v4433_v50  ;;  %v4441_v41 = vld [vmem:[#allocation8 + $0xc4] ss:$8 sps:$4 sm:$0xff]  }
 0x23c   :  { %v2465_v60 = vrot.slane %v2464_v23, 1  ;;  %3192 = vmatprep.subr.bf16.mxu0 %v4438_v51 }
 0x23d   :  { %v2471_v61 = vrot.slane %v2470_v58, 1 }
 0x23e   :  { %v2466_v62 = vadd.f32 %v2465_v60, %v2464_v23  ;;  %v4439_v23 = vld [vmem:[#allocation8 + $0xc0] ss:$8 sps:$4 sm:$0xff]  }
 0x23f   :  { %v2472_v0 = vadd.f32 %v2471_v61, %v2470_v58  ;;  %3193 = vmatpush1.bf16.msra.mxu0 %v4436_v53  ;;  %v4442_v58 = vld [vmem:[#allocation8 + $0xd0] ss:$8 sps:$4 sm:$0xff]   ;;  %v4445_v60 = vld [vmem:[#allocation8 + $0xe0] ss:$8 sps:$4 sm:$0xff]  }
 0x240   :  { %v2486_v2 = vmul.f32 0.125, %v2466_v62  ;;  %3194 = vmatprep.subr.bf16.mxu0 %v4441_v41  ;;  %v4448_v61 = vld [vmem:[#allocation8 + $0xf0] ss:$8 sps:$4 sm:$0xff]   ;;  %v4450_v62 = vld [vmem:[#allocation8 + $0xf4] ss:$8 sps:$4 sm:$0xff]  }
 0x241   :  { %v2487_v3 = vmul.f32 0.125, %v2472_v0  ;;  %v4928_v0 = vsub.s32 2, %v4885_v52 }
 0x242   :  { %v4901_v4 = vsub.f32 %v3869_v43, %v2486_v2  ;;  %v4903_v5 = vmul.f32 0.1, %v2486_v2 }
 0x243   :  { %v4905_v7 = vsub.f32 %v3871_v45, %v2487_v3  ;;  %v4907_v9 = vmul.f32 0.1, %v2487_v3  ;;  %3195 = vmatpush1.bf16.msra.mxu0 %v4439_v23  ;;  %v442_v2 = vrot.slane %v4890_v11, %v4928_v0  ;;  %v446_v3 = vrot.slane %v4890_v11, %v4931_v1 }
 0x244   :  { %v2494_v25 = vmul.f32 %v4901_v4, %v4901_v4  ;;  %3196 = vmatprep.subr.bf16.mxu0 %v4444_v57 }
 0x245   :  { %v2495_v12 = vmul.f32 %v4905_v7, %v4905_v7  ;;  %v2633_v8 = vcombine.low %v4903_v5, %v4907_v9 }
 0x246   :  { %v2498_v13 = vrot.slane %v2494_v25, 4 }
 0x247   :  { %v2504_v15 = vrot.slane %v2495_v12, 4  ;;  %3197 = vmatpush1.bf16.msra.mxu0 %v4442_v58 }
 0x248   :  { %v2499_v18 = vadd.f32 %v2498_v13, %v2494_v25  ;;  %3198 = vmatprep.subr.bf16.mxu0 %v4447_v59 }
 0x249   :  { %v2505_v19 = vadd.f32 %v2504_v15, %v2495_v12 }
 0x24a   :  { %v2500_v20 = vrot.slane %v2499_v18, 2 }
 0x24b   :  { %v2506_v22 = vrot.slane %v2505_v19, 2  ;;  %3199 = vmatpush1.bf16.msra.mxu0 %v4445_v60 }
 0x24c   :  { %v2501_v26 = vadd.f32 %v2500_v20, %v2499_v18  ;;  %3200 = vmatprep.subr.bf16.mxu0 %v4450_v62 }
 0x24d   :  { %v2507_v27 = vadd.f32 %v2506_v22, %v2505_v19 }
 0x24e   :  { %v2502_v28 = vrot.slane %v2501_v26, 1 }
 0x24f   :  { %v2508_v31 = vrot.slane %v2507_v27, 1  ;;  %3201 = vmatpush1.bf16.msra.mxu0 %v4448_v61 }
 0x250   :  { %v2503_v33 = vadd.f32 %v2502_v28, %v2501_v26  ;;  %3211 = vmatprep.subr.bf16.mxu0 %v4453_v63  ;;  %v2543_v26 = vunpack.c.l.s4 %v4730_v24 }
 0x251   :  { %v2509_v34 = vadd.f32 %v2508_v31, %v2507_v27 }
 0x252   :  { %v2522_v35 = vmul.f32 0.125, %v2503_v33  ;;  %v2544_v11 = vunpack.c.0.s8 %v2543_v26 }
 0x253   :  { %v2523_v16 = vmul.f32 0.125, %v2509_v34 }
 0x254   :  { %v2528_v30 = vadd.f32 1e-05, %v2522_v35  ;;  %v2662_v42 = vmul.f32 1.1428572, %v2522_v35 }
 0x255   :  { %v2529_v43 = vadd.f32 1e-05, %v2523_v16  ;;  %v2663_v36 = vmul.f32 1.1428572, %v2523_v16  ;;  %v4940_v16 = vsub.s32 %v2544_v11, %v4885_v52 }
 0x256   :  { %4499 = vrsqrt.f32 %v2528_v30  ;;  %v4915_v44 = vmul.f32 0.1, %v2662_v42 }
 0x257   :  { %4501 = vrsqrt.f32 %v2529_v43  ;;  %v4917_v45 = vmul.f32 0.1, %v2663_v36  ;;  %v2641_v47 = vrot.slane %v2633_v8, %v4940_v16 }
 0x259   :  { %v2674_v48 = vcombine.low %v4915_v44, %v4917_v45 }
 0x260   :  { %v4921_v54 = vpop.eup %4499 }
 0x261   :  { %v4923_v55 = vpop.eup %4501 }
 0x262   :  { %v2540_v56 = vcombine.low %v4921_v54, %v4923_v55  ;;  %v2592_v54 = vld [vmem:[#allocation7 + $0x2] ss:$8 sm:$0xf] }
 0x2b0   :  { %v2454_v6 = vpop.f32.mrb[4].mxu1 }
 0x2b1   :  { %v3872_v10 = vadd.f32 %v2454_v6, %v442_v2  ;;  %v2456_v25 = vpop.f32.mrb[5].mxu1 }
 0x2b2   :  { %v3873_v12 = vadd.f32 %v2456_v25, %v446_v3  ;;  %v2458_v13 = vpop.f32.mrb[6].mxu1  ;;  %v2623_v25 = vld [vmem:[#allocation7 + $0x3] ss:$8 sm:$0xf] }
 0x2b3   :  { %v2473_v14 = vrot.slane %v3872_v10, 4  ;;  %v2459_v15 = vpop.f32.mrb[7].mxu1  ;;  %v2624_v13 = vmul.f32 0.9, %v2623_v25 }
 0x2b4   :  { %v2479_v17 = vrot.slane %v3873_v12, 4 }
 0x2b5   :  { %v2474_v18 = vadd.f32 %v3872_v10, %v2473_v14 }
 0x2b6   :  { %v2480_v19 = vadd.f32 %v3873_v12, %v2479_v17  ;;  %v2660_v17 = vld [vmem:[#allocation7 + $0x4] ss:$8 sm:$0xf] }
 0x2b7   :  { %v2475_v20 = vrot.slane %v2474_v18, 2  ;;  %v2661_v26 = vmul.f32 0.9, %v2660_v17  ;;  %v4451_v17 = vld [vmem:[#allocation8 + $0x100] ss:$8 sps:$4 sm:$0xff]  }
 0x2b8   :  { %v2481_v21 = vrot.slane %v2480_v19, 2 }
 0x2b9   :  { %v2476_v22 = vadd.f32 %v2475_v20, %v2474_v18  ;;  %v2682_v18 = vrot.slane %v2674_v48, %v4940_v16  ;;  %v4731_v20 = vmov 1983009808  }
 0x2ba   :  { %v2482_v27 = vadd.f32 %v2481_v21, %v2480_v19  ;;  %v2754_v21 = vunpack.c.l.s4 %v4731_v20  ;;  %v4460_v20 = vld [vmem:[#allocation8 + $0x130] ss:$8 sps:$4 sm:$0xff]  }
 0x2bb   :  { %v2477_v28 = vrot.slane %v2476_v22, 1 }
 0x2bc   :  { %v2483_v29 = vrot.slane %v2482_v27, 1 }
 0x2bd   :  { %v2478_v31 = vadd.f32 %v2477_v28, %v2476_v22 }
 0x2be   :  { %v2484_v32 = vadd.f32 %v2483_v29, %v2482_v27  ;;  %v2755_v29 = vunpack.c.0.s8 %v2754_v21  ;;  %v4465_v21 = vld [vmem:[#allocation8 + $0x144] ss:$8 sps:$4 sm:$0xff]  }
 0x2bf   :  { %v2488_v33 = vmul.f32 0.125, %v2478_v31 }
 0x2c0   :  { %v2489_v34 = vmul.f32 0.125, %v2484_v32 }
 0x2c1   :  { %v4937_v35 = vsub.f32 %v3872_v10, %v2488_v33  ;;  %v2627_v39 = vmul.f32 0.1, %v2488_v33 }
 0x2c2   :  { %v4942_v40 = vsub.f32 %v3873_v12, %v2489_v34  ;;  %v2628_v30 = vmul.f32 0.1, %v2489_v34 }
 0x2c3   :  { %v2496_v42 = vmul.f32 %v4937_v35, %v4937_v35 }
 0x2c4   :  { %v2497_v43 = vmul.f32 %v4942_v40, %v4942_v40  ;;  %v2634_v36 = vcombine.low %v2627_v39, %v2628_v30 }
 0x2c5   :  { %v2510_v46 = vrot.slane %v2496_v42, 4 }
 0x2c6   :  { %v2516_v49 = vrot.slane %v2497_v43, 4  ;;  %v2648_v50 = vrot.slane %v2634_v36, %v4940_v16 }
 0x2c7   :  { %v2511_v51 = vadd.f32 %v2510_v46, %v2496_v42  ;;  %v2758_v46 = vsub.s32 %v2755_v29, %v4885_v52  ;;  %v2601_v52 = vrot.slane %v2592_v54, %v4893_v38  ;;  %v4474_v29 = vld [vmem:[#allocation8 + $0x174] ss:$8 sps:$4 sm:$0xff]  }
 0x2c8   :  { %v2517_v53 = vadd.f32 %v2516_v49, %v2497_v43  ;;  %v2649_v41 = vcombine.low %v2641_v47, %v2648_v50  ;;  %v2548_v43 = vrot.slane %v2540_v56, %v4940_v16 }
 0x2c9   :  { %v2512_v23 = vrot.slane %v2511_v51, 2 }
 0x2ca   :  { %v2518_v57 = vrot.slane %v2517_v53, 2  ;;  %v2656_v14 = vrot.slane %v2649_v41, %v4940_v16 }
 0x2cb   :  { %v2513_v58 = vadd.f32 %v2512_v23, %v2511_v51 }
 0x2cc   :  { %v2519_v59 = vadd.f32 %v2518_v57, %v2517_v53  ;;  %v2658_v22 = vadd.f32 %v2656_v14, %v2624_v13  ;;  %v2527_v57 = vld [vmem:[#allocation7 + $0x1] ss:$8 sm:$0xf] }
 0x2cd   :  { %v2514_v60 = vrot.slane %v2513_v58, 1 }
 0x2ce   :  { %v2520_v61 = vrot.slane %v2519_v59, 1  ;;  %v2704_v32 = vrot.slane %v2658_v22, %v4888_v37  ;;  %v2708_v44 = vrot.slane %v2658_v22, %v4893_v38  ;;  %v2712_v45 = vrot.slane %v2658_v22, %v4928_v0 }
 0x2cf   :  { %v2515_v62 = vadd.f32 %v2514_v60, %v2513_v58  ;;  %v2716_v48 = vrot.slane %v2658_v22, %v4931_v1  ;;  %v4463_v22 = vld [vmem:[#allocation8 + $0x140] ss:$8 sps:$4 sm:$0xff]  }
 0x2d0   :  { %v2521_v63 = vadd.f32 %v2520_v61, %v2519_v59  ;;  %v2597_v61 = vrot.slane %v2592_v54, %v4888_v37 }
 0x2d1   :  { %v2524_v2 = vmul.f32 0.125, %v2515_v62  ;;  %v2609_v62 = vrot.slane %v2592_v54, %v4931_v1 }
 0x2d2   :  { %v2525_v3 = vmul.f32 0.125, %v2521_v63  ;;  %v2605_v63 = vrot.slane %v2592_v54, %v4928_v0 }
 0x2d3   :  { %v2530_v6 = vadd.f32 1e-05, %v2524_v2  ;;  %v2664_v10 = vmul.f32 1.1428572, %v2524_v2 }
 0x2d4   :  { %v2531_v5 = vadd.f32 1e-05, %v2525_v3  ;;  %v2665_v9 = vmul.f32 1.1428572, %v2525_v3 }
 0x2d5   :  { %4503 = vrsqrt.f32 %v2530_v6  ;;  %v2668_v8 = vmul.f32 0.1, %v2664_v10 }
 0x2d6   :  { %4505 = vrsqrt.f32 %v2531_v5  ;;  %v2669_v12 = vmul.f32 0.1, %v2665_v9 }
 0x2d8   :  { %v2675_v15 = vcombine.low %v2668_v8, %v2669_v12 }
 0x2da   :  { %v2689_v19 = vrot.slane %v2675_v15, %v4940_v16 }
 0x2dc   :  { %v2690_v24 = vcombine.low %v2682_v18, %v2689_v19  ;;  %v4462_v19 = vld [vmem:[#allocation8 + $0x134] ss:$8 sps:$4 sm:$0xff]  }
 0x2de   :  { %v2697_v27 = vrot.slane %v2690_v24, %v4940_v16  ;;  %v4468_v24 = vld [vmem:[#allocation8 + $0x154] ss:$8 sps:$4 sm:$0xff]  }
 0x2df   :  { %v4504_v28 = vpop.eup %4503 }
 0x2e0   :  { %v4506_v31 = vpop.eup %4505  ;;  %v2699_v11 = vadd.f32 %v2697_v27, %v2661_v26  ;;  %v4466_v26 = vld [vmem:[#allocation8 + $0x150] ss:$8 sps:$4 sm:$0xff]   ;;  %v4471_v27 = vld [vmem:[#allocation8 + $0x164] ss:$8 sps:$4 sm:$0xff]  }
 0x2e1   :  { %v2541_v33 = vcombine.low %v4504_v28, %v4506_v31  ;;  %v4469_v28 = vld [vmem:[#allocation8 + $0x160] ss:$8 sps:$4 sm:$0xff]   ;;  %v4472_v31 = vld [vmem:[#allocation8 + $0x170] ss:$8 sps:$4 sm:$0xff]  }
 0x2e2   :  { %v2725_v34 = vrot.slane %v2699_v11, %v4888_v37  ;;  %v2729_v39 = vrot.slane %v2699_v11, %v4893_v38  ;;  %v2733_v30 = vrot.slane %v2699_v11, %v4928_v0  ;;  %v2737_v42 = vrot.slane %v2699_v11, %v4931_v1  ;;  %v4477_v11 = vld [vmem:[#allocation8 + $0x184] ss:$8 sps:$4 sm:$0xff]  }
 0x2e3   :  { %v2555_v36 = vrot.slane %v2541_v33, %v4940_v16  ;;  %v4480_v33 = vld [vmem:[#allocation8 + $0x194] ss:$8 sps:$4 sm:$0xff]  }
 0x2e4   :  { %v2743_v47 = vsel %vm2742_vm0, %v2704_v32, %v2725_v34  ;;  %v2744_v49 = vsel %vm2742_vm0, %v2708_v44, %v2729_v39  ;;  %v2745_v50 = vsel %vm2742_vm0, %v2712_v45, %v2733_v30  ;;  %v2746_v51 = vsel %vm2742_vm0, %v2716_v48, %v2737_v42  ;;  %v4475_v32 = vld [vmem:[#allocation8 + $0x180] ss:$8 sps:$4 sm:$0xff]   ;;  %v4478_v44 = vld [vmem:[#allocation8 + $0x190] ss:$8 sps:$4 sm:$0xff]   ;;  %v4483_v45 = vld [vmem:[#allocation8 + $0x1a4] ss:$8 sps:$4 sm:$0xff]  }
 0x2e5   :  { %v2556_v53 = vcombine.low %v2548_v43, %v2555_v36  ;;  %v2751_v41 = vcombine.low %v2743_v47, %v2744_v49  ;;  %v2752_v23 = vcombine.low %v2745_v50, %v2746_v51  ;;  %v4481_v48 = vld [vmem:[#allocation8 + $0x1a0] ss:$8 sps:$4 sm:$0xff]   ;;  %v4486_v34 = vld [vmem:[#allocation8 + $0x1b4] ss:$8 sps:$4 sm:$0xff]   ;;  %v4484_v39 = vld [vmem:[#allocation8 + $0x1b0] ss:$8 sps:$4 sm:$0xff]  }
 0x2e6   :  { %v4489_v30 = vld [vmem:[#allocation8 + $0x1c4] ss:$8 sps:$4 sm:$0xff]   ;;  %v4487_v42 = vld [vmem:[#allocation8 + $0x1c0] ss:$8 sps:$4 sm:$0xff]   ;;  %v4492_v43 = vld [vmem:[#allocation8 + $0x1d4] ss:$8 sps:$4 sm:$0xff]  }
 0x2e7   :  { %v2563_v58 = vrot.slane %v2556_v53, %v4940_v16  ;;  %v2759_v55 = vrot.slane %v2751_v41, %v2758_v46  ;;  %v2766_v56 = vrot.slane %v2752_v23, %v2758_v46  ;;  %v4490_v36 = vld [vmem:[#allocation8 + $0x1d0] ss:$8 sps:$4 sm:$0xff]   ;;  %v4495_v46 = vld [vmem:[#allocation8 + $0x1e4] ss:$8 sps:$4 sm:$0xff]   ;;  %v4493_v47 = vld [vmem:[#allocation8 + $0x1e0] ss:$8 sps:$4 sm:$0xff]  }
 0x2e8   :  { %v4498_v49 = vld [vmem:[#allocation8 + $0x1f4] ss:$8 sps:$4 sm:$0xff]   ;;  %v4496_v50 = vld [vmem:[#allocation8 + $0x1f0] ss:$8 sps:$4 sm:$0xff]  }
 0x2e9   :  { %v2565_v59 = vmul.f32 %v2563_v58, %v2527_v57  ;;  %v2767_v60 = vcombine.low %v2759_v55, %v2766_v56 }
 0x2eb   :  { %v2582_v2 = vrot.slane %v2565_v59, %v4931_v1  ;;  %v2574_v3 = vrot.slane %v2565_v59, %v4893_v38  ;;  %v2570_v6 = vrot.slane %v2565_v59, %v4888_v37  ;;  %v2578_v10 = vrot.slane %v2565_v59, %v4928_v0  ;;  %2769 = vst [vmem:[#allocation14] sm:$0xff] %v2767_v60  ;;  %v4456_v0 = vld [vmem:[#allocation8 + $0x114] ss:$8 sps:$4 sm:$0xff]  }
 0x2ed   :  { %v2590_v5 = vmul.f32 %v2582_v2, %v4942_v40  ;;  %v2588_v9 = vmul.f32 %v2574_v3, %v4905_v7  ;;  %v2587_v8 = vmul.f32 %v2570_v6, %v4901_v4  ;;  %v2589_v25 = vmul.f32 %v2578_v10, %v4937_v35  ;;  %v4454_v4 = vld [vmem:[#allocation8 + $0x110] ss:$8 sps:$4 sm:$0xff]   ;;  %v4459_v35 = vld [vmem:[#allocation8 + $0x124] ss:$8 sps:$4 sm:$0xff]   ;;  %v4457_v40 = vld [vmem:[#allocation8 + $0x120] ss:$8 sps:$4 sm:$0xff]  }
 0x2ef   :  { %v2615_v12 = vadd.f32 %v2601_v52, %v2588_v9  ;;  %v2614_v13 = vadd.f32 %v2597_v61, %v2587_v8  ;;  %v2617_v14 = vadd.f32 %v2609_v62, %v2590_v5  ;;  %v4991_v15 = vadd.f32 %v2605_v63, %v2589_v25 }
 0x2f1   :  { %2619 = vst [vmem:[#allocation11 + $0x8] sm:$0xff] %v2615_v12  ;;  %v2771_v1 = vpack.c.bf16 %v2615_v12, %v2615_v12  ;;  %v2770_v18 = vpack.c.bf16 %v2614_v13, %v2614_v13  ;;  %2618 = vst [vmem:[#allocation11] sm:$0xff] %v2614_v13  ;;  %v2773_v7 = vpack.c.bf16 %v2617_v14, %v2617_v14 }
 0x2f2   :  { %2621 = vst [vmem:[#allocation11 + $0x18] sm:$0xff] %v2617_v14  ;;  %2620 = vst [vmem:[#allocation11 + $0x10] sm:$0xff] %v4991_v15  ;;  %v2772_v51 = vpack.c.bf16 %v4991_v15, %v4991_v15 }
 0x2f3   :  { %3202 = vmatprep.mubr.bf16.mxu0 %v2771_v1 }
 0x2f4   :  { %3203 = vmatmul.mubr.bf16.vlgmr.msra.gmra.mrb[4].mxu0 %v2770_v18 }
 0x2f5   :  { %3212 = vmatpush1.bf16.msra.mxu0 %v4451_v17  ;;  %3243 = vmatprep.mubr.bf16.mxu0 %v2773_v7 }
 0x2f6   :  { %3213 = vmatprep.subr.bf16.mxu0 %v4456_v0 }
 0x2f9   :  { %3214 = vmatpush1.bf16.msra.mxu0 %v4454_v4 }
 0x2fa   :  { %3215 = vmatprep.subr.bf16.mxu0 %v4459_v35 }
 0x2fd   :  { %3216 = vmatpush1.bf16.msra.mxu0 %v4457_v40 }
 0x2fe   :  { %3217 = vmatprep.subr.bf16.mxu0 %v4462_v19 }
 0x301   :  { %3218 = vmatpush1.bf16.msra.mxu0 %v4460_v20 }
 0x302   :  { %3219 = vmatprep.subr.bf16.mxu0 %v4465_v21 }
 0x305   :  { %3220 = vmatpush1.bf16.msra.mxu0 %v4463_v22 }
 0x306   :  { %3221 = vmatprep.subr.bf16.mxu0 %v4468_v24 }
 0x309   :  { %3222 = vmatpush1.bf16.msra.mxu0 %v4466_v26 }
 0x30a   :  { %3223 = vmatprep.subr.bf16.mxu0 %v4471_v27 }
 0x30d   :  { %3224 = vmatpush1.bf16.msra.mxu0 %v4469_v28 }
 0x30e   :  { %3225 = vmatprep.subr.bf16.mxu0 %v4474_v29 }
 0x311   :  { %3226 = vmatpush1.bf16.msra.mxu0 %v4472_v31 }
 0x312   :  { %3227 = vmatprep.subr.bf16.mxu0 %v4477_v11 }
 0x315   :  { %3228 = vmatpush1.bf16.msra.mxu0 %v4475_v32 }
 0x316   :  { %3229 = vmatprep.subr.bf16.mxu0 %v4480_v33 }
 0x319   :  { %3230 = vmatpush1.bf16.msra.mxu0 %v4478_v44 }
 0x31a   :  { %3231 = vmatprep.subr.bf16.mxu0 %v4483_v45 }
 0x31d   :  { %3232 = vmatpush1.bf16.msra.mxu0 %v4481_v48 }
 0x31e   :  { %3233 = vmatprep.subr.bf16.mxu0 %v4486_v34 }
 0x321   :  { %3234 = vmatpush1.bf16.msra.mxu0 %v4484_v39 }
 0x322   :  { %3235 = vmatprep.subr.bf16.mxu0 %v4489_v30 }
 0x325   :  { %3236 = vmatpush1.bf16.msra.mxu0 %v4487_v42 }
 0x326   :  { %3237 = vmatprep.subr.bf16.mxu0 %v4492_v43 }
 0x329   :  { %3238 = vmatpush1.bf16.msra.mxu0 %v4490_v36 }
 0x32a   :  { %3239 = vmatprep.subr.bf16.mxu0 %v4495_v46 }
 0x32d   :  { %3240 = vmatpush1.bf16.msra.mxu0 %v4493_v47 }
 0x32e   :  { %3241 = vmatprep.subr.bf16.mxu0 %v4498_v49 }
 0x331   :  { %3242 = vmatpush1.bf16.msra.mxu0 %v4496_v50 }
 0x334   :  { %3244 = vmatmul.mubr.bf16.vlgmr.msra.gmra.mrb[4].mxu0 %v2772_v51 }
 0x335   :  { %4632 = shalt.err (!%p4629_p2)
}
 0x336   :  { %s4633_s23 = scalar_lea.hbm %s5077_s5, 512 }
 0x337   :  { %p4634_p3 = scmp.ne.s32.totalorder %s5077_s5, %s4633_s23  ;;  %p4637_p4 = scmp.lt.u32.totalorder %s4633_s23, %s5077_s5 }
 0x339   :  { %p4639_p5 = pnand %p4637_p4, %p4634_p3 }
 0x33b   :  { %4642 = shalt.err (!%p4639_p5)
}
 0x33c   :  { %3434 = dma.vmem_to_hbm [thread:$0]  %s3432_s21, 512, %s5077_s5, [#allocation4]   ;;  %v2838_v53 = vld [vmem:[#allocation10] ss:$8 sm:$0x3] }
 0x33d   :  { %v2843_v41 = vrot.slane %v2838_v53, %v4888_v37  ;;  %v2847_v23 = vrot.slane %v2838_v53, %v4893_v38  ;;  %v3340_v34 = vld [vmem:[#allocation10 + $0x3] ss:$8 sm:$0x3]  ;;  %v3364_v30 = vld [vmem:[#allocation10 + $0x4] ss:$8 sm:$0x3] }
 0x33e   :  { %v3341_v42 = vmul.f32 0.9, %v3340_v34  ;;  %v3365_v46 = vmul.f32 0.9, %v3364_v30  ;;  %s4733_s5 = smov [#allocation15]  }
 0x33f   :  { %s3461_s28 = sshll.u32 %s4733_s5, 4  ;;  %s3462_s28 = int_to_ptr.vmem [resolvable:$true] %s3461_s28 }
 0x340   :  { %s4643_s0 = scalar_lea.vmem %s3462_s28, 64  ;;  %p4648_p7 = scmp.lt.s32.totalorder %s3462_s28, %s3462_s28 }
 0x341   :  { %p4644_p6 = scmp.ne.s32.totalorder %s3462_s28, %s4643_s0  ;;  %p4649_p8 = scmp.lt.s32.totalorder %s4643_s0, %s4643_s0 }
 0x343   :  { %p4650_p9 = por %p4649_p8, %p4648_p7 }
 0x345   :  { %p4651_p10 = pnand %p4650_p9, %p4644_p6 }
 0x407   :  { %v3245_v57 = vpop.f32.mrb[4].mxu0 }
 0x408   :  { %v3874_v58 = vadd.f32 %v3245_v57, %v2843_v41  ;;  %v3247_v54 = vpop.f32.mrb[5].mxu0 }
 0x409   :  { %v3875_v55 = vadd.f32 %v3247_v54, %v2847_v23  ;;  %v3249_v56 = vpop.f32.mrb[6].mxu0 }
 0x40a   :  { %v3252_v59 = vrot.slane %v3874_v58, 4  ;;  %v3250_v60 = vpop.f32.mrb[7].mxu0 }
 0x40b   :  { %v3258_v52 = vrot.slane %v3875_v55, 4 }
 0x40c   :  { %v3253_v61 = vadd.f32 %v3874_v58, %v3252_v59 }
 0x40d   :  { %v3259_v62 = vadd.f32 %v3875_v55, %v3258_v52 }
 0x40e   :  { %v3254_v63 = vrot.slane %v3253_v61, 2 }
 0x40f   :  { %v3260_v2 = vrot.slane %v3259_v62, 2 }
 0x410   :  { %v3255_v3 = vadd.f32 %v3254_v63, %v3253_v61  ;;  %v3285_v61 = vld [vmem:[#allocation10 + $0x1] ss:$8 sm:$0x3]  ;;  %v3323_v63 = vld [vmem:[#allocation10 + $0x2] ss:$8 sm:$0x3] }
 0x411   :  { %v3261_v6 = vadd.f32 %v3260_v2, %v3259_v62 }
 0x412   :  { %v3256_v10 = vrot.slane %v3255_v3, 1 }
 0x413   :  { %v3262_v5 = vrot.slane %v3261_v6, 1 }
 0x414   :  { %v3257_v9 = vadd.f32 %v3256_v10, %v3255_v3 }
 0x415   :  { %v3263_v8 = vadd.f32 %v3262_v5, %v3261_v6 }
 0x416   :  { %v3264_v25 = vmul.f32 0.125, %v3257_v9 }
 0x417   :  { %v3265_v12 = vmul.f32 0.125, %v3263_v8 }
 0x418   :  { %v5010_v13 = vsub.f32 %v3874_v58, %v3264_v25  ;;  %v3342_v14 = vmul.f32 0.1, %v3264_v25 }
 0x419   :  { %v5012_v15 = vsub.f32 %v3875_v55, %v3265_v12  ;;  %v3343_v1 = vmul.f32 0.1, %v3265_v12 }
 0x41a   :  { %v3268_v17 = vmul.f32 %v5010_v13, %v5010_v13 }
 0x41b   :  { %v3269_v18 = vmul.f32 %v5012_v15, %v5012_v15  ;;  %v3346_v0 = vcombine.low %v3342_v14, %v3343_v1 }
 0x41c   :  { %v3270_v7 = vrot.slane %v3268_v17, 4 }
 0x41d   :  { %v3276_v4 = vrot.slane %v3269_v18, 4  ;;  %v3353_v44 = vrot.slane %v3346_v0, %v4940_v16 }
 0x41e   :  { %v3271_v35 = vadd.f32 %v3270_v7, %v3268_v17 }
 0x41f   :  { %v3277_v40 = vadd.f32 %v3276_v4, %v3269_v18  ;;  %v3360_v43 = vrot.slane %v3353_v44, %v4940_v16 }
 0x420   :  { %v3272_v19 = vrot.slane %v3271_v35, 2 }
 0x421   :  { %v3278_v20 = vrot.slane %v3277_v40, 2  ;;  %v3362_v49 = vadd.f32 %v3360_v43, %v3341_v42 }
 0x422   :  { %v3273_v21 = vadd.f32 %v3272_v19, %v3271_v35 }
 0x423   :  { %v3279_v22 = vadd.f32 %v3278_v20, %v3277_v40  ;;  %v3393_v23 = vrot.slane %v3362_v49, %v4888_v37  ;;  %v3397_v57 = vrot.slane %v3362_v49, %v4893_v38 }
 0x424   :  { %v3274_v24 = vrot.slane %v3273_v21, 1 }
 0x425   :  { %v3280_v26 = vrot.slane %v3279_v22, 1 }
 0x426   :  { %v3275_v27 = vadd.f32 %v3274_v24, %v3273_v21 }
 0x427   :  { %v3281_v28 = vadd.f32 %v3280_v26, %v3279_v22 }
 0x428   :  { %v3282_v29 = vmul.f32 0.125, %v3275_v27 }
 0x429   :  { %v3283_v31 = vmul.f32 0.125, %v3281_v28 }
 0x42a   :  { %v3286_v11 = vadd.f32 1e-05, %v3282_v29  ;;  %v3366_v32 = vmul.f32 1.1428572, %v3282_v29 }
 0x42b   :  { %v3287_v33 = vadd.f32 1e-05, %v3283_v31  ;;  %v3367_v45 = vmul.f32 1.1428572, %v3283_v31 }
 0x42c   :  { %4507 = vrsqrt.f32 %v3286_v11  ;;  %v3368_v48 = vmul.f32 0.1, %v3366_v32 }
 0x42d   :  { %4509 = vrsqrt.f32 %v3287_v33  ;;  %v3369_v39 = vmul.f32 0.1, %v3367_v45 }
 0x42f   :  { %v3372_v36 = vcombine.low %v3368_v48, %v3369_v39 }
 0x431   :  { %v3379_v47 = vrot.slane %v3372_v36, %v4940_v16 }
 0x433   :  { %v3386_v50 = vrot.slane %v3379_v47, %v4940_v16 }
 0x435   :  { %v3388_v51 = vadd.f32 %v3386_v50, %v3365_v46 }
 0x436   :  { %v4508_v53 = vpop.eup %4507 }
 0x437   :  { %v4510_v41 = vpop.eup %4509  ;;  %v3404_v58 = vrot.slane %v3388_v51, %v4888_v37  ;;  %v3408_v54 = vrot.slane %v3388_v51, %v4893_v38 }
 0x438   :  { %v3292_v55 = vcombine.low %v4508_v53, %v4510_v41 }
 0x439   :  { %v3411_v56 = vsel %vm2742_vm0, %v3393_v23, %v3404_v58  ;;  %v3412_v59 = vsel %vm2742_vm0, %v3397_v57, %v3408_v54 }
 0x43a   :  { %v3299_v60 = vrot.slane %v3292_v55, %v4940_v16  ;;  %v3415_v52 = vcombine.low %v3411_v56, %v3412_v59 }
 0x43c   :  { %v3306_v62 = vrot.slane %v3299_v60, %v4940_v16  ;;  %3867 = vst.sshfl [vmem:[#allocation15] sm:$0x33 pattern:$0x76325410] %v3415_v52 }
 0x43d   :  { %4654 = shalt.err (!%p4651_p10)
}
 0x43e   :  { %s4655_s10 = scalar_lea.hbm %s5080_s8, 64 }
 0x43f   :  { %p4656_p11 = scmp.ne.s32.totalorder %s5080_s8, %s4655_s10  ;;  %p4659_p12 = scmp.lt.u32.totalorder %s4655_s10, %s5080_s8 }
 0x441   :  { %p4661_p13 = pnand %p4659_p12, %p4656_p11 }
 0x443   :  { %4664 = shalt.err (!%p4661_p13)
}
 0x444   :  { %3464 = dma.vmem_to_hbm [thread:$0]  %s3462_s28, 64, %s5080_s8, [#allocation16]   ;;  %v3308_v16 = vmul.f32 %v3306_v62, %v3285_v61  ;;  %v3328_v6 = vrot.slane %v3323_v63, %v4888_v37  ;;  %v3332_v10 = vrot.slane %v3323_v63, %v4893_v38 }
 0x445   :  { %s4734_s18 = smov [#allocation12]   ;;  %s4735_s2 = smov [#allocation14]  }
 0x446   :  { %v3317_v2 = vrot.slane %v3308_v16, %v4893_v38  ;;  %v3313_v3 = vrot.slane %v3308_v16, %v4888_v37  ;;  %s3441_s19 = sshll.u32 %s4734_s18, 4  ;;  %s3451_s13 = sshll.u32 %s4735_s2, 4  ;;  %s3442_s19 = int_to_ptr.vmem [resolvable:$true] %s3441_s19  ;;  %s3452_s13 = int_to_ptr.vmem [resolvable:$true] %s3451_s13 }
 0x447   :  { %s4665_s8 = scalar_lea.vmem %s3442_s19, 256  ;;  %p4670_p1 = scmp.lt.s32.totalorder %s3442_s19, %s3442_s19 }
 0x448   :  { %v3321_v5 = vmul.f32 %v3317_v2, %v5012_v15  ;;  %v3320_v9 = vmul.f32 %v3313_v3, %v5010_v13  ;;  %p4666_p0 = scmp.ne.s32.totalorder %s3442_s19, %s4665_s8  ;;  %p4671_p2 = scmp.lt.s32.totalorder %s4665_s8, %s4665_s8 }
 0x44a   :  { %v3335_v8 = vadd.f32 %v3328_v6, %v3320_v9  ;;  %v3336_v25 = vadd.f32 %v3332_v10, %v3321_v5  ;;  %p4672_p3 = por %p4671_p2, %p4670_p1 }
 0x44c   :  { %3337 = vst [vmem:[#allocation12] sm:$0xff] %v3335_v8  ;;  %3338 = vst [vmem:[#allocation12 + $0x8] sm:$0xff] %v3336_v25  ;;  %p4673_p4 = pnand %p4672_p3, %p4666_p0 }
 0x44e   :  { %4676 = shalt.err (!%p4673_p4)
}
 0x44f   :  { %s4677_s3 = scalar_lea.hbm %s5078_s6, 256 }
 0x450   :  { %p4678_p5 = scmp.ne.s32.totalorder %s5078_s6, %s4677_s3  ;;  %p4681_p6 = scmp.lt.u32.totalorder %s4677_s3, %s5078_s6 }
 0x452   :  { %p4683_p7 = pnand %p4681_p6, %p4678_p5 }
 0x454   :  { %4686 = shalt.err (!%p4683_p7)
}
 0x455   :  { %3444 = dma.vmem_to_hbm [thread:$0]  %s3442_s19, 256, %s5078_s6, [#allocation13]  }
 0x456   :  { %s4687_s27 = scalar_lea.vmem %s3452_s13, 128  ;;  %p4692_p9 = scmp.lt.s32.totalorder %s3452_s13, %s3452_s13 }
 0x457   :  { %p4688_p8 = scmp.ne.s32.totalorder %s3452_s13, %s4687_s27  ;;  %p4693_p10 = scmp.lt.s32.totalorder %s4687_s27, %s4687_s27 }
 0x459   :  { %p4694_p11 = por %p4693_p10, %p4692_p9 }
 0x45b   :  { %p4695_p12 = pnand %p4694_p11, %p4688_p8 }
 0x45d   :  { %4698 = shalt.err (!%p4695_p12)
}
 0x45e   :  { %s4699_s5 = scalar_lea.hbm %s5079_s7, 128 }
 0x45f   :  { %p4700_p13 = scmp.ne.s32.totalorder %s5079_s7, %s4699_s5  ;;  %p4703_p0 = scmp.lt.u32.totalorder %s4699_s5, %s5079_s7 }
 0x461   :  { %p4705_p1 = pnand %p4703_p0, %p4700_p13 }
 0x463   :  { %4708 = shalt.err (!%p4705_p1)
}
 0x464   :  { %3454 = dma.vmem_to_hbm [thread:$0]  %s3452_s13, 128, %s5079_s7, [#allocation13]  }
 0x465   :  { %4715 = dma.done.wait [#allocation4], 512  }
 0x466   :  { %4716 = vsyncadd [#allocation4], 4294966784 }
 0x467   :  { %4717 = dma.done.wait [#allocation13], 384  }
 0x468   :  { %4718 = vsyncadd [#allocation13], 4294966912 }
 0x469   :  { %4719 = dma.done.wait [#allocation16], 64  }
 0x46a   :  { %4720 = vsyncadd [#allocation16], 4294967232 }
 0x46b   :  { %3477 = vsyncpa [#allocation3], 1 }
 0x46c   :  { %3478 = vsyncpa [#allocation6], 1 }
 0x46d   :  { %3479 = vsyncpa [#allocation9], 1 }
 0x46e   :  { %3480 = vsyncpa [#allocation4], 1 }
 0x46f   :  { %3481 = vsyncpa [#allocation13], 1 }
 0x470   :  { %3482 = vsyncpa [#allocation16], 1 }

</bundles_post_ra>
